<compile_context>
chip_gen: v6e
topology: v6e:2x2x1
jax: 0.10.0
libtpu: 0.0.40
codegen_flags: <defaults>
</compile_context>

<pallas_src>
import jax
import jax.numpy as jnp
from jax.experimental import pallas as pl
from jax.experimental.pallas import tpu as pltpu


CONV_CH = 16           # synthetic encoder conv channels
CONV_CH_PAD = 128      # lane-padded conv channels (zero cost, lane-dense)
EMB_DIM = 128
HIDDEN = 64
HIDDEN_PAD = 128       # lane-padded hidden width (zero-padded cols/rows)
NUM_CLASSES = 3
NUM_CLASSES_PAD = 128  # lane-dense logits store; sliced back in the wrapper


def _round_up(x, m):
    return -(-x // m) * m


def _kpad(in_channels):
    return max(128, _round_up(9 * in_channels, 128))


def _make_kernel(hw):
    inv_hw = 1.0 / float(hw)

    def kernel(x_ref,        # (N*L, K_PAD)                  bf16  im2col, one image
               conv_w_ref,   # (K_PAD, CONV_CH_PAD)          bf16
               conv_b_ref,   # (1, CONV_CH_PAD)              f32
               pool_ref,     # (N, N*L)                      bf16  block-diag ones
               enc_w_ref,    # (CONV_CH_PAD, EMB_DIM)        bf16
               enc_b_ref,    # (1, EMB_DIM)                  f32
               fc1_w_ref,    # (EMB_DIM, HIDDEN_PAD)         bf16
               fc1_b_ref,    # (1, HIDDEN_PAD)               f32
               fc2_w_ref,    # (HIDDEN_PAD, NUM_CLASSES_PAD) bf16
               fc2_b_ref,    # (1, NUM_CLASSES_PAD)          f32
               out_ref):     # (1, NUM_CLASSES_PAD)          f32
        # Conv2d(C -> 16, 3x3, padding=1) + ReLU for ALL views of this image as
        # a single bf16 MXU matmul (taps folded into the contraction dim).
        conv = jnp.dot(x_ref[...], conv_w_ref[...],
                       preferred_element_type=jnp.float32)            # (N*L, 128) f32
        conv = jnp.maximum(conv + conv_b_ref[...], 0.0)

        # Per-view global average pool on the MXU: block-diagonal ones matrix,
        # exact 1/(H*W) scaling applied in f32 afterwards.
        pooled = jnp.dot(pool_ref[...], conv.astype(jnp.bfloat16),
                         preferred_element_type=jnp.float32) * inv_hw  # (N, 128)

        # Encoder projection + ReLU -> per-view embeddings.
        feat = jnp.dot(pooled.astype(jnp.bfloat16), enc_w_ref[...],
                       preferred_element_type=jnp.float32) + enc_b_ref[...]
        feat = jnp.maximum(feat, 0.0)                                   # (N, EMB)

        # features.view(B, N, -1).mean(dim=1): mean over the N views.
        mean_feat = jnp.mean(feat, axis=0, keepdims=True)               # (1, EMB) f32

        # Classifier head.
        # TODO(synk): Dropout(0.3) is identity at inference; training-mode RNG
        # masking (pltpu.prng_seed / prng_random_bits) is not implemented.
        h = jnp.dot(mean_feat.astype(jnp.bfloat16), fc1_w_ref[...],
                    preferred_element_type=jnp.float32) + fc1_b_ref[...]
        h = jnp.maximum(h, 0.0)
        logits = jnp.dot(h.astype(jnp.bfloat16), fc2_w_ref[...],
                         preferred_element_type=jnp.float32) + fc2_b_ref[...]
        out_ref[...] = logits

    return kernel


def cnn_classifier_forward(images, params, num_classes=NUM_CLASSES):
    """images: (B, N, C, H, W) float32 (NCHW per view, like PyTorch)."""
    B, N, C, H, W = images.shape
    L = H * W
    K_PAD = params["conv_w"].shape[0]

    # Host-side im2col, lane-dense minor dim: (B, N*L, K_PAD) bf16.
    x = jnp.transpose(images, (0, 1, 3, 4, 2))                     # (B, N, H, W, C)
    xp = jnp.pad(x, ((0, 0), (0, 0), (1, 1), (1, 1), (0, 0)))
    taps = [xp[:, :, dy:dy + H, dx:dx + W, :] for dy in range(3) for dx in range(3)]
    patches = jnp.concatenate(taps, axis=-1).reshape(B, N * L, 9 * C)
    patches = jnp.pad(patches, ((0, 0), (0, 0), (0, K_PAD - 9 * C))).astype(jnp.bfloat16)

    # Block-diagonal per-view pooling matrix of ones (scaled by 1/(H*W) in-kernel).
    pool = jnp.repeat(jnp.eye(N, dtype=jnp.bfloat16), L, axis=1)   # (N, N*L)

    kernel = _make_kernel(L)

    def _resident(a):  # whole-array block, constant index -> DMA'd exactly once
        return pl.BlockSpec(a.shape, lambda b: (0,) * a.ndim)

    in_specs = [
        pl.BlockSpec((None, N * L, K_PAD), lambda b: (b, 0, 0)),   # one image per step
        _resident(params["conv_w"]),
        _resident(params["conv_b"]),
        _resident(pool),
        _resident(params["enc_w"]),
        _resident(params["enc_b"]),
        _resident(params["fc1_w"]),
        _resident(params["fc1_b"]),
        _resident(params["fc2_w"]),
        _resident(params["fc2_b"]),
    ]
    out_spec = pl.BlockSpec((None, 1, NUM_CLASSES_PAD), lambda b: (b, 0, 0))

    out = pl.pallas_call(
        kernel,
        out_shape=jax.ShapeDtypeStruct((B, 1, NUM_CLASSES_PAD), jnp.float32),
        grid_spec=pltpu.PrefetchScalarGridSpec(
            num_scalar_prefetch=0,
            grid=(B,),
            in_specs=in_specs,
            out_specs=out_spec,
        ),
        compiler_params=pltpu.CompilerParams(
            dimension_semantics=("parallel",),
            vmem_limit_bytes=32 * 1024 * 1024,
        ),
    )(patches, params["conv_w"], params["conv_b"], pool,
      params["enc_w"], params["enc_b"],
      params["fc1_w"], params["fc1_b"],
      params["fc2_w"], params["fc2_b"])

    return out[:, 0, :num_classes]


def init_params(key, in_channels=4, conv_channels=CONV_CH, embedding_dim=EMB_DIM,
                hidden=HIDDEN, num_classes=NUM_CLASSES):
    ks = jax.random.split(key, 8)
    s = 0.1
    K_PAD = _kpad(in_channels)
    # Synthetic encoder: Conv2d(C,16,3,pad=1) -> ReLU -> GAP -> Linear(16,128) -> ReLU
    w_oihw = s * jax.random.normal(ks[0], (conv_channels, in_channels, 3, 3), jnp.float32)
    # (Cout, Cin, kh, kw) -> (kh, kw, Cin, Cout) -> (9*Cin, Cout); zero-pad K and Cout.
    conv_w = jnp.transpose(w_oihw, (2, 3, 1, 0)).reshape(9 * in_channels, conv_channels)
    conv_w = jnp.pad(conv_w, ((0, K_PAD - 9 * in_channels),
                              (0, CONV_CH_PAD - conv_channels)))
    conv_b = jnp.pad(s * jax.random.normal(ks[1], (1, conv_channels), jnp.float32),
                     ((0, 0), (0, CONV_CH_PAD - conv_channels)))
    enc_w = jnp.pad(s * jax.random.normal(ks[2], (conv_channels, embedding_dim), jnp.float32),
                    ((0, CONV_CH_PAD - conv_channels), (0, 0)))
    enc_b = s * jax.random.normal(ks[3], (1, embedding_dim), jnp.float32)
    fc1_w = jnp.pad(s * jax.random.normal(ks[4], (embedding_dim, hidden), jnp.float32),
                    ((0, 0), (0, HIDDEN_PAD - hidden)))
    fc1_b = jnp.pad(s * jax.random.normal(ks[5], (1, hidden), jnp.float32),
                    ((0, 0), (0, HIDDEN_PAD - hidden)))
    fc2_w = jnp.pad(s * jax.random.normal(ks[6], (hidden, num_classes), jnp.float32),
                    ((0, HIDDEN_PAD - hidden), (0, NUM_CLASSES_PAD - num_classes)))
    fc2_b = jnp.pad(s * jax.random.normal(ks[7], (1, num_classes), jnp.float32),
                    ((0, 0), (0, NUM_CLASSES_PAD - num_classes)))
    return {
        "conv_w": conv_w.astype(jnp.bfloat16),
        "conv_b": conv_b,
        "enc_w": enc_w.astype(jnp.bfloat16),
        "enc_b": enc_b,
        "fc1_w": fc1_w.astype(jnp.bfloat16),
        "fc1_b": fc1_b,
        "fc2_w": fc2_w.astype(jnp.bfloat16),
        "fc2_b": fc2_b,
    }


def reference_forward(images, params, num_classes=NUM_CLASSES):
    """Pure-JAX/XLA reference mirroring the PyTorch forward (eval mode)."""
    B, N, C, H, W = images.shape
    x = images.astype(jnp.bfloat16).astype(jnp.float32).reshape(B * N, C, H, W)
    w = params["conv_w"][:9 * C, :CONV_CH].astype(jnp.float32).reshape(3, 3, C, CONV_CH)
    w_oihw = jnp.transpose(w, (3, 2, 0, 1))
    conv = jax.lax.conv_general_dilated(
        x, w_oihw, window_strides=(1, 1), padding="SAME",
        dimension_numbers=("NCHW", "OIHW", "NCHW"))
    conv = jnp.maximum(conv + params["conv_b"][:, :CONV_CH].reshape(1, -1, 1, 1), 0.0)
    pooled_sp = conv.mean(axis=(2, 3))                               # global avg pool
    feat = jnp.maximum(pooled_sp @ params["enc_w"][:CONV_CH].astype(jnp.float32)
                       + params["enc_b"], 0.0)
    pooled = feat.reshape(B, N, -1).mean(axis=1)                     # mean over N views
    h = jnp.maximum(pooled @ params["fc1_w"].astype(jnp.float32) + params["fc1_b"], 0.0)
    logits = h @ params["fc2_w"].astype(jnp.float32) + params["fc2_b"]
    return logits[:, :num_classes]


if __name__ == "__main__":
    key = jax.random.PRNGKey(0)
    k_img, k_par = jax.random.split(key)

    B, N, C, H, W = 2, 4, 4, 16, 16
    images = jax.random.normal(k_img, (B, N, C, H, W), jnp.float32)
    params = init_params(k_par, in_channels=C)

    logits = jax.block_until_ready(cnn_classifier_forward(images, params))
    ref = reference_forward(images, params)

    assert logits.shape == (B, NUM_CLASSES), logits.shape
    assert jnp.allclose(logits, ref, rtol=2e-2, atol=5e-3), (logits, ref)
    print("KERNEL_OK")
</pallas_src>

<mosaic_0001>
module attributes {stable_mosaic.version = 11 : i64} {
  func.func @kernel(%arg0: i32, %arg1: memref<1x1024x128xbf16, #tpu.memory_space<vmem>>, %arg2: memref<128x128xbf16, #tpu.memory_space<vmem>>, %arg3: memref<1x128xf32, #tpu.memory_space<vmem>>, %arg4: memref<4x1024xbf16, #tpu.memory_space<vmem>>, %arg5: memref<128x128xbf16, #tpu.memory_space<vmem>>, %arg6: memref<1x128xf32, #tpu.memory_space<vmem>>, %arg7: memref<128x128xbf16, #tpu.memory_space<vmem>>, %arg8: memref<1x128xf32, #tpu.memory_space<vmem>>, %arg9: memref<128x128xbf16, #tpu.memory_space<vmem>>, %arg10: memref<1x128xf32, #tpu.memory_space<vmem>>, %arg11: memref<1x1x128xf32, #tpu.memory_space<vmem>>) attributes {dimension_semantics = [#tpu.dimension_semantics<parallel>], iteration_bounds = array<i64: 2>, scalar_prefetch = 0 : i64, scratch_operands = 0 : i64, tpu.core_type = #tpu.core_type<tc>, window_params = [{transform_indices = @transform_0, window_bounds = array<i64: 1, 1024, 128>}, {pipeline_mode = #tpu.pipeline_mode<synchronous>, transform_indices = @transform_1, window_bounds = array<i64: 128, 128>}, {pipeline_mode = #tpu.pipeline_mode<synchronous>, transform_indices = @transform_2, window_bounds = array<i64: 1, 128>}, {pipeline_mode = #tpu.pipeline_mode<synchronous>, transform_indices = @transform_3, window_bounds = array<i64: 4, 1024>}, {pipeline_mode = #tpu.pipeline_mode<synchronous>, transform_indices = @transform_4, window_bounds = array<i64: 128, 128>}, {pipeline_mode = #tpu.pipeline_mode<synchronous>, transform_indices = @transform_5, window_bounds = array<i64: 1, 128>}, {pipeline_mode = #tpu.pipeline_mode<synchronous>, transform_indices = @transform_6, window_bounds = array<i64: 128, 128>}, {pipeline_mode = #tpu.pipeline_mode<synchronous>, transform_indices = @transform_7, window_bounds = array<i64: 1, 128>}, {pipeline_mode = #tpu.pipeline_mode<synchronous>, transform_indices = @transform_8, window_bounds = array<i64: 128, 128>}, {pipeline_mode = #tpu.pipeline_mode<synchronous>, transform_indices = @transform_9, window_bounds = array<i64: 1, 128>}, {transform_indices = @transform_10, window_bounds = array<i64: 1, 1, 128>}]} {
    %c0 = arith.constant 0 : index
    %c0_0 = arith.constant 0 : index
    %c0_1 = arith.constant 0 : index
    %0 = vector.load %arg1[%c0, %c0_0, %c0_1] : memref<1x1024x128xbf16, #tpu.memory_space<vmem>>, vector<1x1024x128xbf16>
    %1 = vector.shape_cast %0 : vector<1x1024x128xbf16> to vector<1024x128xbf16>
    %c0_2 = arith.constant 0 : index
    %c0_3 = arith.constant 0 : index
    %2 = vector.load %arg2[%c0_2, %c0_3] : memref<128x128xbf16, #tpu.memory_space<vmem>>, vector<128x128xbf16>
    %cst = arith.constant dense<0.000000e+00> : vector<1024x128xf32>
    %3 = tpu.matmul %1, %2, %cst {dimension_numbers = #tpu.dot_dimension_numbers<[1], [0], [0], [1], [0, 0, 1, 1], [], []>} : vector<1024x128xbf16>, vector<128x128xbf16>, vector<1024x128xf32> -> vector<1024x128xf32>
    %c0_4 = arith.constant 0 : index
    %c0_5 = arith.constant 0 : index
    %4 = vector.load %arg3[%c0_4, %c0_5] : memref<1x128xf32, #tpu.memory_space<vmem>>, vector<1x128xf32>
    %5 = vector.broadcast %4 : vector<1x128xf32> to vector<1024x128xf32>
    %6 = arith.addf %3, %5 : vector<1024x128xf32>
    %cst_6 = arith.constant 0.000000e+00 : f32
    %7 = vector.broadcast %cst_6 : f32 to vector<1024x128xf32>
    %8 = arith.maximumf %6, %7 : vector<1024x128xf32>
    %c0_7 = arith.constant 0 : index
    %c0_8 = arith.constant 0 : index
    %9 = vector.load %arg4[%c0_7, %c0_8] : memref<4x1024xbf16, #tpu.memory_space<vmem>>, vector<4x1024xbf16>
    %10 = arith.truncf %8 : vector<1024x128xf32> to vector<1024x128xbf16>
    %cst_9 = arith.constant dense<0.000000e+00> : vector<4x128xf32>
    %11 = tpu.matmul %9, %10, %cst_9 {dimension_numbers = #tpu.dot_dimension_numbers<[1], [0], [0], [1], [0, 0, 1, 1], [], []>} : vector<4x1024xbf16>, vector<1024x128xbf16>, vector<4x128xf32> -> vector<4x128xf32>
    %cst_10 = arith.constant 3.906250e-03 : f32
    %12 = vector.broadcast %cst_10 : f32 to vector<4x128xf32>
    %13 = arith.mulf %11, %12 : vector<4x128xf32>
    %14 = arith.truncf %13 : vector<4x128xf32> to vector<4x128xbf16>
    %c0_11 = arith.constant 0 : index
    %c0_12 = arith.constant 0 : index
    %15 = vector.load %arg5[%c0_11, %c0_12] : memref<128x128xbf16, #tpu.memory_space<vmem>>, vector<128x128xbf16>
    %cst_13 = arith.constant dense<0.000000e+00> : vector<4x128xf32>
    %16 = tpu.matmul %14, %15, %cst_13 {dimension_numbers = #tpu.dot_dimension_numbers<[1], [0], [0], [1], [0, 0, 1, 1], [], []>} : vector<4x128xbf16>, vector<128x128xbf16>, vector<4x128xf32> -> vector<4x128xf32>
    %c0_14 = arith.constant 0 : index
    %c0_15 = arith.constant 0 : index
    %17 = vector.load %arg6[%c0_14, %c0_15] : memref<1x128xf32, #tpu.memory_space<vmem>>, vector<1x128xf32>
    %18 = vector.broadcast %17 : vector<1x128xf32> to vector<4x128xf32>
    %19 = arith.addf %16, %18 : vector<4x128xf32>
    %cst_16 = arith.constant 0.000000e+00 : f32
    %20 = vector.broadcast %cst_16 : f32 to vector<4x128xf32>
    %21 = arith.maximumf %19, %20 : vector<4x128xf32>
    %cst_17 = arith.constant dense<0.000000e+00> : vector<128xf32>
    %22 = vector.multi_reduction <add>, %21, %cst_17 [0] : vector<4x128xf32> to vector<128xf32>
    %23 = vector.shape_cast %22 : vector<128xf32> to vector<1x128xf32>
    %cst_18 = arith.constant 4.000000e+00 : f32
    %24 = vector.broadcast %cst_18 : f32 to vector<1x128xf32>
    %25 = arith.divf %23, %24 : vector<1x128xf32>
    %26 = arith.truncf %25 : vector<1x128xf32> to vector<1x128xbf16>
    %c0_19 = arith.constant 0 : index
    %c0_20 = arith.constant 0 : index
    %27 = vector.load %arg7[%c0_19, %c0_20] : memref<128x128xbf16, #tpu.memory_space<vmem>>, vector<128x128xbf16>
    %cst_21 = arith.constant dense<0.000000e+00> : vector<1x128xf32>
    %28 = tpu.matmul %26, %27, %cst_21 {dimension_numbers = #tpu.dot_dimension_numbers<[1], [0], [0], [1], [0, 0, 1, 1], [], []>} : vector<1x128xbf16>, vector<128x128xbf16>, vector<1x128xf32> -> vector<1x128xf32>
    %c0_22 = arith.constant 0 : index
    %c0_23 = arith.constant 0 : index
    %29 = vector.load %arg8[%c0_22, %c0_23] : memref<1x128xf32, #tpu.memory_space<vmem>>, vector<1x128xf32>
    %30 = arith.addf %28, %29 : vector<1x128xf32>
    %cst_24 = arith.constant 0.000000e+00 : f32
    %31 = vector.broadcast %cst_24 : f32 to vector<1x128xf32>
    %32 = arith.maximumf %30, %31 : vector<1x128xf32>
    %33 = arith.truncf %32 : vector<1x128xf32> to vector<1x128xbf16>
    %c0_25 = arith.constant 0 : index
    %c0_26 = arith.constant 0 : index
    %34 = vector.load %arg9[%c0_25, %c0_26] : memref<128x128xbf16, #tpu.memory_space<vmem>>, vector<128x128xbf16>
    %cst_27 = arith.constant dense<0.000000e+00> : vector<1x128xf32>
    %35 = tpu.matmul %33, %34, %cst_27 {dimension_numbers = #tpu.dot_dimension_numbers<[1], [0], [0], [1], [0, 0, 1, 1], [], []>} : vector<1x128xbf16>, vector<128x128xbf16>, vector<1x128xf32> -> vector<1x128xf32>
    %c0_28 = arith.constant 0 : index
    %c0_29 = arith.constant 0 : index
    %36 = vector.load %arg10[%c0_28, %c0_29] : memref<1x128xf32, #tpu.memory_space<vmem>>, vector<1x128xf32>
    %37 = arith.addf %35, %36 : vector<1x128xf32>
    %c0_30 = arith.constant 0 : index
    %c0_31 = arith.constant 0 : index
    %c0_32 = arith.constant 0 : index
    %38 = vector.load %arg11[%c0_30, %c0_31, %c0_32] : memref<1x1x128xf32, #tpu.memory_space<vmem>>, vector<1x1x128xf32>
    %39 = vector.shape_cast %38 : vector<1x1x128xf32> to vector<1x128xf32>
    %40 = vector.shape_cast %37 : vector<1x128xf32> to vector<1x1x128xf32>
    tpu.vector_store %arg11[%c0_30, %c0_31, %c0_32], %40 {strides = array<i32>} : memref<1x1x128xf32, #tpu.memory_space<vmem>>, vector<1x1x128xf32>,
    return
  }
  func.func @transform_0(%arg0: i32) -> (i32, i32, i32) {
    %c0_i32 = arith.constant 0 : i32
    %c0_i32_0 = arith.constant 0 : i32
    %c0_i32_1 = arith.constant 0 : i32
    return %arg0, %c0_i32, %c0_i32_0 : i32, i32, i32
  }
  func.func @transform_1(%arg0: i32) -> (i32, i32) {
    %c0_i32 = arith.constant 0 : i32
    %c0_i32_0 = arith.constant 0 : i32
    %c0_i32_1 = arith.constant 0 : i32
    return %c0_i32, %c0_i32_0 : i32, i32
  }
  func.func @transform_2(%arg0: i32) -> (i32, i32) {
    %c0_i32 = arith.constant 0 : i32
    %c0_i32_0 = arith.constant 0 : i32
    %c0_i32_1 = arith.constant 0 : i32
    return %c0_i32, %c0_i32_0 : i32, i32
  }
  func.func @transform_3(%arg0: i32) -> (i32, i32) {
    %c0_i32 = arith.constant 0 : i32
    %c0_i32_0 = arith.constant 0 : i32
    %c0_i32_1 = arith.constant 0 : i32
    return %c0_i32, %c0_i32_0 : i32, i32
  }
  func.func @transform_4(%arg0: i32) -> (i32, i32) {
    %c0_i32 = arith.constant 0 : i32
    %c0_i32_0 = arith.constant 0 : i32
    %c0_i32_1 = arith.constant 0 : i32
    return %c0_i32, %c0_i32_0 : i32, i32
  }
  func.func @transform_5(%arg0: i32) -> (i32, i32) {
    %c0_i32 = arith.constant 0 : i32
    %c0_i32_0 = arith.constant 0 : i32
    %c0_i32_1 = arith.constant 0 : i32
    return %c0_i32, %c0_i32_0 : i32, i32
  }
  func.func @transform_6(%arg0: i32) -> (i32, i32) {
    %c0_i32 = arith.constant 0 : i32
    %c0_i32_0 = arith.constant 0 : i32
    %c0_i32_1 = arith.constant 0 : i32
    return %c0_i32, %c0_i32_0 : i32, i32
  }
  func.func @transform_7(%arg0: i32) -> (i32, i32) {
    %c0_i32 = arith.constant 0 : i32
    %c0_i32_0 = arith.constant 0 : i32
    %c0_i32_1 = arith.constant 0 : i32
    return %c0_i32, %c0_i32_0 : i32, i32
  }
  func.func @transform_8(%arg0: i32) -> (i32, i32) {
    %c0_i32 = arith.constant 0 : i32
    %c0_i32_0 = arith.constant 0 : i32
    %c0_i32_1 = arith.constant 0 : i32
    return %c0_i32, %c0_i32_0 : i32, i32
  }
  func.func @transform_9(%arg0: i32) -> (i32, i32) {
    %c0_i32 = arith.constant 0 : i32
    %c0_i32_0 = arith.constant 0 : i32
    %c0_i32_1 = arith.constant 0 : i32
    return %c0_i32, %c0_i32_0 : i32, i32
  }
  func.func @transform_10(%arg0: i32) -> (i32, i32, i32) {
    %c0_i32 = arith.constant 0 : i32
    %c0_i32_0 = arith.constant 0 : i32
    %c0_i32_1 = arith.constant 0 : i32
    return %arg0, %c0_i32, %c0_i32_0 : i32, i32, i32
  }
}

</mosaic_0001>

<bundles_post_ra>
// kernel: tpu_custom_call.1
= control target key start
LH: loop header
LB: loop body
LE: loop exit
PB: predicated region body
PF: predicated region fallthrough
CT: control target
= control target key end

     0   :  { %s4120_s0 = inlined_call_operand.hbm [shape: bf16[2,1024,128], index: 0, kind: input, shape index: {}]   ;;  %s4121_s1 = inlined_call_operand.hbm [shape: bf16[128,128], index: 1, kind: input, shape index: {}]   ;;  %s4122_s2 = inlined_call_operand.vmem [shape: f32[1,128], index: 2, kind: input, shape index: {}]   ;;  %s4123_s3 = inlined_call_operand.hbm [shape: bf16[4,1024], index: 3, kind: input, shape index: {}]   ;;  %s4124_s4 = inlined_call_operand.hbm [shape: bf16[128,128], index: 4, kind: input, shape index: {}]   ;;  %s4125_s5 = inlined_call_operand.vmem [shape: f32[1,128], index: 5, kind: input, shape index: {}]   ;;  %s4126_s6 = inlined_call_operand.hbm [shape: bf16[128,128], index: 6, kind: input, shape index: {}]   ;;  %s4127_s7 = inlined_call_operand.vmem [shape: f32[1,128], index: 7, kind: input, shape index: {}]   ;;  %s4128_s8 = inlined_call_operand.hbm [shape: bf16[128,128], index: 8, kind: input, shape index: {}]   ;;  %s4129_s9 = inlined_call_operand.vmem [shape: f32[1,128], index: 9, kind: input, shape index: {}]   ;;  %s4130_s10 = inlined_call_operand.hbm [shape: f32[2,1,128], index: 10, kind: output, shape index: {}]  }
   0x1   :  { %4137 = sst [smem:[#allocation19_spill]] %s4121_s1 }
   0x2   :  { %4138 = sst [smem:[#allocation20_spill]] %s4123_s3 }
   0x3   :  { %4139 = sst [smem:[#allocation21_spill]] %s4124_s4 }
   0x4   :  { %4140 = sst [smem:[#allocation22_spill]] %s4126_s6 }
   0x5   :  { %15 = vsyncpa [#allocation3], 0 }
   0x6   :  { %17 = vsyncpa [#allocation3 + $0x1], 0 }
   0x7   :  { %18 = vsyncpa [#allocation6], 0 }
   0x8   :  { %19 = vsyncpa [#allocation9], 0 }
   0x9   :  { %20 = vsyncpa [#allocation12], 0 }
   0xa   :  { %21 = vsyncpa [#allocation4], 0 }
   0xb   :  { %23 = vsyncpa [#allocation4 + $0x1], 0  ;;  %s3455_s13 = smov 0   ;;  %s3457_s14 = smov 0  }
   0xc   :  { %s3459_s15 = smov 0   ;;  %s3461_s16 = smov 0  }
   0xd LB: > { %s3388_s17 = smov [#allocation5]   ;;  %s3476_s19 = sadd.s32 4294967295, %s3386_s16   ;;  %s3386_s16 = sphi %s3461_s16, %s4168_s16   ;;  %s3382_s15 = sphi %s3459_s15, %s4167_s15   ;;  %s3378_s14 = sphi %s3457_s14, %s4166_s14   ;;  %s3374_s13 = sphi %s3455_s13, %s4165_s13  }
   0xe   : > { %s287_s18 = sshll.u32 %s3388_s17, 4  ;;  %p2441_p0 = scmp.ge.s32.totalorder %s3386_s16, 1  ;;  %s288_s18 = int_to_ptr.vmem [resolvable:$true] %s287_s18 }
   0xf   : > { %p4133_p1 = scmp.eq.s32.totalorder %s3476_s19, 0  ;;  %p275_p2 = scmp.lt.s32.totalorder %s3386_s16, 3 }
  0x10   : > { %s3389_s21 = smov [#allocation8]   ;;  %s3390_s24 = smov [#allocation7]  }
  0x11   : > { %p3481_p3 = pnand %p2441_p0, %p275_p2  ;;  %s314_s22 = sshll.u32 %s3389_s21, 4  ;;  %s3494_s22 = int_to_ptr.vmem [resolvable:$true] %s314_s22 }
  0x12   : > { %s304_s25 = sshll.u32 %s3390_s24, 4  ;;  %s3163_s27 = scalar_lea.vmem %s288_s18, 1024  ;;  %s3496_s25 = int_to_ptr.vmem [resolvable:$true] %s304_s25 }
  0x13   : > { %s4141_s20 = scalar_select %p3481_p3, 1, 0 }
  0x14   : > { %p2975_p5 = pneg %p3481_p3  ;;  %p3164_p8 = scmp.ne.s32.totalorder %s288_s18, %s3163_s27 }
  0x15   : > { %p3171_p11 = scmp.lt.s32.totalorder %s288_s18, %s288_s18  ;;  %p3172_p12 = scmp.lt.s32.totalorder %s3163_s27, %s3163_s27 }
  0x16   : > { %p3490_p6 = pnand %p2975_p5, %p4133_p1 }
  0x17   : > { %p3173_p13 = por %p3172_p12, %p3171_p11 }
  0x18   : > { %p3500_p7 = pneg %p3490_p6 }
  0x1a   : > { %p3166_p9 = pnand %p3164_p8, %p3500_p7 }
  0x1c   : > { %p3167_p10 = pneg %p3166_p9 }
  0x1e   : > { %p3174_p0 = pnand %p3173_p13, %p3167_p10 }
  0x20   : > { %3177 = shalt.err (!%p3174_p0)
}
  0x21   : > { %s4131_s28 = smov 64   ;;  %s4132_s29 = smov 4  }
  0x22   : > { %s4144_s1 = sld [smem:[#allocation19_spill]]  ;;  %s3189_s12 = scalar_lea.vmem %s3494_s22, 1024 }
  0x23   : > { %p3190_p2 = scmp.ne.s32.totalorder %s3494_s22, %s3189_s12  ;;  %p3197_p9 = scmp.lt.s32.totalorder %s3494_s22, %s3494_s22 }
  0x24   : > { %p3198_p10 = scmp.lt.s32.totalorder %s3189_s12, %s3189_s12 }
  0x25   : > { %p3192_p5 = pnand %p3190_p2, %p3500_p7 }
  0x26   : > { %p3199_p11 = por %p3198_p10, %p3197_p9 }
  0x27   : > { %p3193_p8 = pneg %p3192_p5 }
  0x28   : > { %2978 = dma.hbm_to_vmem [thread:$0]  (!%p3490_p6), %s4144_s1, 1024, %s288_s18, [#allocation6], %s4131_s28, %s4131_s28, %s4132_s29  }
  0x29   : > { %p3200_p12 = pnand %p3199_p11, %p3193_p8 }
  0x2b   : > { %3203 = shalt.err (!%p3200_p12)
}
  0x2c   : > { %s4145_s4 = sld [smem:[#allocation21_spill]]  ;;  %s3215_s18 = scalar_lea.vmem %s3496_s25, 256 }
  0x2d   : > { %p3216_p13 = scmp.ne.s32.totalorder %s3496_s25, %s3215_s18  ;;  %p3223_p5 = scmp.lt.s32.totalorder %s3496_s25, %s3496_s25 }
  0x2e   : > { %p3224_p8 = scmp.lt.s32.totalorder %s3215_s18, %s3215_s18 }
  0x2f   : > { %p3218_p0 = pnand %p3216_p13, %p3500_p7 }
  0x30   : > { %p3225_p9 = por %p3224_p8, %p3223_p5 }
  0x31   : > { %p3219_p2 = pneg %p3218_p0 }
  0x32   : > { %2984 = dma.hbm_to_vmem [thread:$0]  (!%p3490_p6), %s4145_s4, 1024, %s3494_s22, [#allocation9], %s4131_s28, %s4131_s28, %s4132_s29  }
  0x33   : > { %p3226_p10 = pnand %p3225_p9, %p3219_p2 }
  0x35   : > { %3229 = shalt.err (!%p3226_p10)
}
  0x36   : > { %s4146_s3 = sld [smem:[#allocation20_spill]]  ;;  %s3393_s22 = smov [#allocation10]  }
  0x37   : > { %s330_s30 = sshll.u32 %s3393_s22, 4  ;;  %s3394_s11 = smov [#allocation11]   ;;  %s331_s30 = int_to_ptr.vmem [resolvable:$true] %s330_s30 }
  0x38   : > { %s346_s12 = sshll.u32 %s3394_s11, 4  ;;  %s3241_s17 = scalar_lea.vmem %s331_s30, 1024  ;;  %s347_s12 = int_to_ptr.vmem [resolvable:$true] %s346_s12 }
  0x39   : > { %p3242_p11 = scmp.ne.s32.totalorder %s331_s30, %s3241_s17  ;;  %p3249_p0 = scmp.lt.s32.totalorder %s331_s30, %s331_s30 }
  0x3a   : > { %p3250_p2 = scmp.lt.s32.totalorder %s3241_s17, %s3241_s17 }
  0x3b   : > { %p3244_p12 = pnand %p3242_p11, %p3500_p7 }
  0x3c   : > { %2981 = dma.hbm_to_vmem [thread:$0]  (!%p3490_p6), %s4146_s3, 256, %s3496_s25, [#allocation6]  }
  0x3d   : > { %p3245_p13 = pneg %p3244_p12  ;;  %p3251_p5 = por %p3250_p2, %p3249_p0 }
  0x3f   : > { %p3252_p8 = pnand %p3251_p5, %p3245_p13 }
  0x41   : > { %3255 = shalt.err (!%p3252_p8)
}
  0x42   : > { %s4147_s6 = sld [smem:[#allocation22_spill]]  ;;  %s3267_s18 = scalar_lea.vmem %s347_s12, 1024 }
  0x43   : > { %p3268_p9 = scmp.ne.s32.totalorder %s347_s12, %s3267_s18  ;;  %p3275_p12 = scmp.lt.s32.totalorder %s347_s12, %s347_s12 }
  0x44   : > { %p3276_p0 = scmp.lt.s32.totalorder %s3267_s18, %s3267_s18 }
  0x45   : > { %p3270_p10 = pnand %p3268_p9, %p3500_p7 }
  0x46   : > { %p3277_p13 = por %p3276_p0, %p3275_p12 }
  0x47   : > { %p3271_p11 = pneg %p3270_p10 }
  0x48   : > { %2987 = dma.hbm_to_vmem [thread:$0]  (!%p3490_p6), %s4147_s6, 1024, %s331_s30, [#allocation9], %s4131_s28, %s4131_s28, %s4132_s29  }
  0x49   : > { %p3278_p2 = pnand %p3277_p13, %p3271_p11 }
  0x4b   : > { %3281 = shalt.err (!%p3278_p2)
}
  0x4c   : > { %2990 = dma.hbm_to_vmem [thread:$0]  (!%p3490_p6), %s4128_s8, 1024, %s347_s12, [#allocation12], %s4131_s28, %s4131_s28, %s4132_s29  }
  0x4d   : > { %s2440_s23 = sadd.s32 4294967294, %s3386_s16   ;;  %s3563_s26 = sadd.s32 1, %s3386_s16  }
  0x4e   : > { %s36_s22 = sadd.s32 1, %s3382_s15  ;;  %s33_s30 = ssub.s32 %s3386_s16, %s3563_s26 }
  0x4f   : > { %p43_p7 = scmp.ne.s32.totalorder %s3382_s15, %s3378_s14  ;;  %p34_p5 = scmp.eq.s32.totalorder %s33_s30, 0 }
  0x50   : > { %p44_p8 = scmp.eq.s32.totalorder %s3386_s16, 0  ;;  %p49_p9 = scmp.ne.s32.totalorder %s3378_s14, %s3374_s13 }
  0x51   : > { %p262_p10 = scmp.eq.s32.totalorder %s3476_s19, 1  ;;  %p268_p0 = scmp.eq.s32.totalorder %s2440_s23, 1 }
  0x52   : > { %s3575_s11 = scalar_select %p34_p5, %s3382_s15, %s36_s22  }
  0x53   : > { %p45_p11 = por %p44_p8, %p43_p7  ;;  %p3579_p12 = por %p4133_p1, %p49_p9 }
  0x54   : > { %p3583_p6 = por %p262_p10, %p43_p7  ;;  %p3004_p13 = scmp.lt.s32.totalorder %s3386_s16, 2 }
  0x55   : > { %s4148_s17 = scalar_select %p3579_p12, 1, 0 }
  0x56   : > { %s4149_s12 = scalar_select %p3583_p6, 1, 0 }
  0x57   : > { %s363_s25 = sand.u32 1, %s3382_s15   ;;  %p3589_p2 = por %p268_p0, %p49_p9 }
  0x58   : > { %s2448_s18 = sshll.u32 %s363_s25, 9  ;;  %s2559_s24 = sshll.u32 %s3386_s16, 13 }
  0x59   : > { %s4150_s21 = scalar_select %p3589_p2, 1, 0 }
  0x5a   : > { %s3597_s30 = scalar_lea.hbm %s4120_s0, %s2559_s24  ;;  %s367_s28 = scalar_lea.vmem [#allocation2], %s2448_s18 }
  0x5b   : > { %s374_s29 = sshll.u32 %s367_s28, 4  ;;  %p3599_p7 = pnand %p3004_p13, %p45_p11  ;;  %s3603_s29 = int_to_ptr.vmem [resolvable:$true] %s374_s29 }
  0x5c   : > { %s3605_s1 = scalar_lea.sflag [#allocation3], %s363_s25  ;;  %s3282_s3 = scalar_lea.hbm %s3597_s30, 8192 }
  0x5d   : > { %p3283_p5 = scmp.ne.s32.totalorder %s3597_s30, %s3282_s3  ;;  %p3284_p8 = pneg %p3599_p7 }
  0x5e   : > { %s3287_s18 = scalar_lea.hbm %s4120_s0, 16384  ;;  %p3288_p11 = scmp.lt.s32.totalorder %s3597_s30, %s4120_s0 }
  0x5f   : > { %p3285_p9 = pnand %p3284_p8, %p3283_p5  ;;  %p3289_p0 = scmp.lt.s32.totalorder %s3287_s18, %s3282_s3 }
  0x61   : > { %p3286_p10 = pneg %p3285_p9  ;;  %p3290_p13 = por %p3289_p0, %p3288_p11 }
  0x63   : > { %p3291_p4 = pnand %p3290_p13, %p3286_p10 }
  0x65   : > { %3294 = shalt.err (!%p3291_p4)
}
  0x66   : > { %s3295_s25 = scalar_lea.vmem %s3603_s29, 8192  ;;  %s3395_s4 = smov [#allocation2]  }
  0x67   : > { %p3296_p1 = scmp.ne.s32.totalorder %s3603_s29, %s3295_s25  ;;  %s3300_s6 = sshll.u32 %s3395_s4, 4  ;;  %s3301_s6 = int_to_ptr.vmem [resolvable:$false] %s3300_s6 }
  0x68   : > { %s3302_s24 = scalar_lea.vmem %s3301_s6, 16384  ;;  %p3303_p9 = scmp.lt.s32.totalorder %s3603_s29, %s3301_s6 }
  0x69   : > { %p3298_p2 = pnand %p3296_p1, %p3284_p8  ;;  %p3304_p6 = scmp.lt.s32.totalorder %s3302_s24, %s3295_s25 }
  0x6b   : > { %p3299_p5 = pneg %p3298_p2  ;;  %p3305_p12 = por %p3304_p6, %p3303_p9 }
  0x6d   : > { %p3306_p3 = pnand %p3305_p12, %p3299_p5 }
  0x6f   : > { %3309 = shalt.err (!%p3306_p3)
}
  0x70   : > { %s4152_s3 = smov 4   ;;  %s4153_s27 = smov 64  }
  0x71   : > { %2994 = dma.hbm_to_vmem [thread:$0]  (!%p3599_p7), %s3597_s30, 8192, %s3603_s29, %s3605_s1, %s4153_s27, %s4153_s27, %s4152_s3  }
  0x72   : > { %p4154_p1 = scmp.ne.s32.totalorder %s4141_s20, 0 }
  0x73   : > { %s3632_s4 = sand.u32 (!%p4154_p1), 1, %s3378_s14   ;;  %p4155_p3 = scmp.ne.s32.totalorder (!%p4154_p1), %s4148_s17, 0 }
  0x74   : > { %386 = sbr.rel (%p4154_p1) target bundleno = 1473 (0x5c1), region = 60  ;;  %s2452_s6 = sshll.u32 (!%p4154_p1), %s3632_s4, 9 }
  0x75   : > { %s389_s18 = scalar_lea.sflag (!%p4154_p1), [#allocation3], %s3632_s4  ;;  %s3636_s28 = scalar_lea.vmem (!%p4154_p1), [#allocation2], %s2452_s6 }
  0x79   : > { %3353 = dma.done.wait (%p4155_p3), %s389_s18, 8192  }
  0x7a   : > { %3355 = vsyncadd (%p4155_p3), %s389_s18, 4294959104  ;;  %p4156_p4 = scmp.eq.s32.totalorder %s3476_s19, 0 }
  0x7c   : > { %3357 = dma.done.wait (%p4156_p4), [#allocation6], 1280   ;;  %p4157_p12 = pmov %p4156_p4 }
  0x7d   : > { %p4158_p6 = pmov %p4156_p4 }
  0x7e   : > { %3359 = vsyncadd (%p4157_p12), [#allocation6], 4294966016 }
  0x7f   : > { %3361 = dma.done.wait (%p4158_p6), [#allocation9], 2048   ;;  %p4159_p2 = pmov %p4156_p4 }
  0x81   : > { %3363 = vsyncadd (%p4159_p2), [#allocation9], 4294965248  ;;  %p4160_p7 = pmov %p4159_p2 }
  0x82   : > { %p4161_p8 = pmov %p4159_p2 }
  0x83   : > { %3365 = dma.done.wait (%p4160_p7), [#allocation12], 1024  }
  0x84   : > { %3367 = vsyncadd (%p4161_p8), [#allocation12], 4294966272  ;;  %v3053_v0 = vld [vmem:[#allocation5 + $0x38] sm:$0xff]   ;;  %v3054_v1 = vld [vmem:[#allocation5 + $0x30] sm:$0xff]   ;;  %v3396_v57 = vmov 1983009808   ;;  %v1777_v59 = vlaneseq }
  0x85   : > { %2747 = vmatprep.subr.bf16.mxu0 %v3053_v0  ;;  %v3055_v2 = vld [vmem:[#allocation5 + $0x28] sm:$0xff]   ;;  %v3056_v3 = vld [vmem:[#allocation5 + $0x20] sm:$0xff]   ;;  %v3057_v5 = vld [vmem:[#allocation5 + $0x18] sm:$0xff]   ;;  %v1775_v58 = vunpack.c.l.s4 %v3396_v57  ;;  %vm3398_vm0 = vmmov 0   ;;  %vm2089_vm1 = vcmask 1043456   ;;  %s2556_s27 = sshll.u32 %s3476_s19, 4 }
  0x86   : > { %2748 = vmatpush3.bf16.msra.mxu0 %v3053_v0  ;;  %v3061_v4 = vld [vmem:[%s3636_s28] sm:$0xff]   ;;  %v3058_v6 = vld [vmem:[#allocation5 + $0x10] sm:$0xff]   ;;  %v3059_v7 = vld [vmem:[#allocation5 + $0x8] sm:$0xff]   ;;  %v1778_v61 = vshrl.u32 %v1777_v59, 7  ;;  %s447_s6 = scalar_lea.vmem [#allocation13], %s3632_s4  ;;  %s4077_s20 = scalar_lea.hbm %s4130_s10, %s2556_s27 }
  0x87   : > { %2749 = vmatprep.subr.bf16.mxu0 %v3054_v1  ;;  %2763 = vmatprep.mubr.bf16.mxu0 %v3061_v4  ;;  %v3060_v8 = vld [vmem:[#allocation5] sm:$0xff]   ;;  %v3062_v9 = vld [vmem:[%s3636_s28 + $0x8] sm:$0xff]   ;;  %v3063_v10 = vld [vmem:[%s3636_s28 + $0x10] sm:$0xff]   ;;  %v1776_v60 = vunpack.c.0.s8 %v1775_v58  ;;  %s2326_s18 = sshll.u32 %s447_s6, 4  ;;  %s2314_s29 = scalar_lea.sflag [#allocation4], %s3632_s4  ;;  %s4079_s18 = int_to_ptr.vmem [resolvable:$true] %s2326_s18 }
  0x88   : > { %v3064_v11 = vld [vmem:[%s3636_s28 + $0x18] sm:$0xff]   ;;  %v3065_v12 = vld [vmem:[%s3636_s28 + $0x20] sm:$0xff]   ;;  %v3066_v13 = vld [vmem:[%s3636_s28 + $0x28] sm:$0xff]   ;;  %s3310_s17 = scalar_lea.vmem %s4079_s18, 16  ;;  %p4162_p11 = scmp.ne.s32.totalorder %s4149_s12, 0 }
  0x89   : > { %v3067_v14 = vld [vmem:[%s3636_s28 + $0x30] sm:$0xff]   ;;  %v3068_v15 = vld [vmem:[%s3636_s28 + $0x38] sm:$0xff]   ;;  %v3069_v16 = vld [vmem:[%s3636_s28 + $0x40] sm:$0xff]   ;;  %v3705_v0 = vsub.s32 %v1776_v60, %v1778_v61  ;;  %p3311_p10 = scmp.ne.s32.totalorder %s4079_s18, %s3310_s17  ;;  %s3399_s19 = smov [#allocation13]  }
  0x8a   : > { %2750 = vmatpush3.bf16.msra.mxu0 %v3054_v1  ;;  %v3070_v17 = vld [vmem:[%s3636_s28 + $0x48] sm:$0xff]   ;;  %v3071_v18 = vld [vmem:[%s3636_s28 + $0x50] sm:$0xff]   ;;  %v3072_v19 = vld [vmem:[%s3636_s28 + $0x58] sm:$0xff]   ;;  %s3314_s30 = sshll.u32 %s3399_s19, 4  ;;  %s3315_s30 = int_to_ptr.vmem [resolvable:$false] %s3314_s30 }
  0x8b   : > { %2751 = vmatprep.subr.bf16.mxu0 %v3055_v2  ;;  %v3073_v20 = vld [vmem:[%s3636_s28 + $0x60] sm:$0xff]   ;;  %v3074_v21 = vld [vmem:[%s3636_s28 + $0x68] sm:$0xff]   ;;  %v3075_v22 = vld [vmem:[%s3636_s28 + $0x70] sm:$0xff]   ;;  %p3312_p0 = pnand %p3311_p10, %p4162_p11  ;;  %s3316_s23 = scalar_lea.vmem %s3315_s30, 32 }
  0x8c   : > { %v3076_v23 = vld [vmem:[%s3636_s28 + $0x78] sm:$0xff]   ;;  %v3077_v24 = vld [vmem:[%s3636_s28 + $0x80] sm:$0xff]   ;;  %v3078_v25 = vld [vmem:[%s3636_s28 + $0x88] sm:$0xff]   ;;  %p3317_p5 = scmp.lt.s32.totalorder %s4079_s18, %s3315_s30  ;;  %p3318_p9 = scmp.lt.s32.totalorder %s3316_s23, %s3310_s17 }
  0x8d   : > { %v3079_v26 = vld [vmem:[%s3636_s28 + $0x90] sm:$0xff]   ;;  %v3080_v27 = vld [vmem:[%s3636_s28 + $0x98] sm:$0xff]   ;;  %v3081_v28 = vld [vmem:[%s3636_s28 + $0xa0] sm:$0xff]   ;;  %p3313_p13 = pneg %p3312_p0 }
  0x8e   : > { %2752 = vmatpush3.bf16.msra.mxu0 %v3055_v2  ;;  %v3082_v29 = vld [vmem:[%s3636_s28 + $0xa8] sm:$0xff]   ;;  %v3083_v30 = vld [vmem:[%s3636_s28 + $0xb0] sm:$0xff]   ;;  %v3084_v31 = vld [vmem:[%s3636_s28 + $0xb8] sm:$0xff]   ;;  %p3319_p1 = por %p3318_p9, %p3317_p5 }
  0x8f   : > { %2753 = vmatprep.subr.bf16.mxu0 %v3056_v3  ;;  %v3085_v32 = vld [vmem:[%s3636_s28 + $0xc0] sm:$0xff]   ;;  %v3086_v33 = vld [vmem:[%s3636_s28 + $0xc8] sm:$0xff]   ;;  %v3087_v34 = vld [vmem:[%s3636_s28 + $0xd0] sm:$0xff]  }
  0x90   : > { %v3088_v35 = vld [vmem:[%s3636_s28 + $0xd8] sm:$0xff]   ;;  %v3089_v36 = vld [vmem:[%s3636_s28 + $0xe0] sm:$0xff]   ;;  %v3090_v37 = vld [vmem:[%s3636_s28 + $0xe8] sm:$0xff]   ;;  %p3320_p3 = pnand %p3319_p1, %p3313_p13 }
  0x91   : > { %v3091_v38 = vld [vmem:[%s3636_s28 + $0xf0] sm:$0xff]   ;;  %v3092_v39 = vld [vmem:[%s3636_s28 + $0xf8] sm:$0xff]   ;;  %v3093_v40 = vld [vmem:[%s3636_s28 + $0x100] sm:$0xff]  }
  0x92   : > { %2754 = vmatpush3.bf16.msra.mxu0 %v3056_v3  ;;  %v3094_v41 = vld [vmem:[%s3636_s28 + $0x108] sm:$0xff]   ;;  %v3095_v42 = vld [vmem:[%s3636_s28 + $0x110] sm:$0xff]   ;;  %v3096_v43 = vld [vmem:[%s3636_s28 + $0x118] sm:$0xff]  }
  0x93   : > { %2755 = vmatprep.subr.bf16.mxu0 %v3057_v5  ;;  %v3097_v44 = vld [vmem:[%s3636_s28 + $0x120] sm:$0xff]   ;;  %v3098_v45 = vld [vmem:[%s3636_s28 + $0x128] sm:$0xff]   ;;  %v3099_v46 = vld [vmem:[%s3636_s28 + $0x130] sm:$0xff]  }
  0x94   : > { %v3100_v47 = vld [vmem:[%s3636_s28 + $0x138] sm:$0xff]   ;;  %v3101_v48 = vld [vmem:[%s3636_s28 + $0x140] sm:$0xff]   ;;  %v3102_v49 = vld [vmem:[%s3636_s28 + $0x148] sm:$0xff]  }
  0x95   : > { %v3103_v50 = vld [vmem:[%s3636_s28 + $0x150] sm:$0xff]   ;;  %v3104_v51 = vld [vmem:[%s3636_s28 + $0x158] sm:$0xff]   ;;  %v3105_v52 = vld [vmem:[%s3636_s28 + $0x160] sm:$0xff]  }
  0x96   : > { %2756 = vmatpush3.bf16.msra.mxu0 %v3057_v5  ;;  %v3106_v53 = vld [vmem:[%s3636_s28 + $0x168] sm:$0xff]   ;;  %v3107_v54 = vld [vmem:[%s3636_s28 + $0x170] sm:$0xff]   ;;  %v3108_v55 = vld [vmem:[%s3636_s28 + $0x178] sm:$0xff]  }
  0x97   : > { %2757 = vmatprep.subr.bf16.mxu0 %v3058_v6  ;;  %v3109_v56 = vld [vmem:[%s3636_s28 + $0x180] sm:$0xff]   ;;  %v3110_v62 = vld [vmem:[%s3636_s28 + $0x188] sm:$0xff]   ;;  %v3111_v63 = vld [vmem:[%s3636_s28 + $0x190] sm:$0xff]  }
  0x98   : > { %v3707_v1 = vld [vmem:[#allocation7] sm:$0xff]  ;;  %v3122_v58 = vld [vmem:[%s3636_s28 + $0x1e8] sm:$0xff]   ;;  %v3123_v59 = vld [vmem:[%s3636_s28 + $0x1f0] sm:$0xff]  }
  0x99   : > { %v3711_v2 = vrot.slane %v3707_v1, %v3705_v0  ;;  %v3716_v4 = vld [vmem:[%s4122_s2] ss:$0 sm:$0xff] }
  0x9a   : > { %2758 = vmatpush3.bf16.msra.mxu0 %v3058_v6 }
  0x9b   : > { %2759 = vmatprep.subr.bf16.mxu0 %v3059_v7  ;;  %v1788_v5 = vcombine.high %v3711_v2, %v3711_v2 }
  0x9d   : > { %1847 = vmatprep.mubr.bf16.mxu1 %v1788_v5 }
  0x9e   : > { %2760 = vmatpush3.bf16.msra.mxu0 %v3059_v7 }
  0x9f   : > { %2761 = vmatprep.subr.bf16.mxu0 %v3060_v8 }
  0xa2   : > { %2762 = vmatpush3.bf16.msra.mxu0 %v3060_v8 }
  0xa5   : > { %2764 = vmatmul.mubr.bf16.vlgmr.msra.gmra.mxu0 %v3062_v9  ;;  %v3112_v9 = vld [vmem:[%s3636_s28 + $0x198] sm:$0xff]  }
  0xa6   : > { %2767 = vmatprep.mubr.bf16.mxu0 %v3063_v10 }
  0xad   : > { %2768 = vmatmul.mubr.bf16.gmra.mxu0 %v3064_v11 }
  0xae   : > { %2771 = vmatprep.mubr.bf16.mxu0 %v3065_v12  ;;  %v3113_v12 = vld [vmem:[%s3636_s28 + $0x1a0] sm:$0xff]  }
  0xb5   : > { %2772 = vmatmul.mubr.bf16.gmra.mxu0 %v3066_v13 }
  0xb6   : > { %2775 = vmatprep.mubr.bf16.mxu0 %v3067_v14 }
  0xbd   : > { %2776 = vmatmul.mubr.bf16.gmra.mxu0 %v3068_v15 }
  0xbe   : > { %2779 = vmatprep.mubr.bf16.mxu0 %v3069_v16 }
  0xc5   : > { %2780 = vmatmul.mubr.bf16.gmra.mxu0 %v3070_v17 }
  0xc6   : > { %2783 = vmatprep.mubr.bf16.mxu0 %v3071_v18 }
  0xcd   : > { %2784 = vmatmul.mubr.bf16.gmra.mxu0 %v3072_v19 }
  0xce   : > { %2787 = vmatprep.mubr.bf16.mxu0 %v3073_v20 }
  0xd5   : > { %2788 = vmatmul.mubr.bf16.gmra.mxu0 %v3074_v21 }
  0xd6   : > { %2791 = vmatprep.mubr.bf16.mxu0 %v3075_v22 }
  0xdd   : > { %2792 = vmatmul.mubr.bf16.gmra.mxu0 %v3076_v23 }
  0xde   : > { %2795 = vmatprep.mubr.bf16.mxu0 %v3077_v24 }
  0xe5   : > { %2796 = vmatmul.mubr.bf16.gmra.mxu0 %v3078_v25  ;;  %v3114_v25 = vld [vmem:[%s3636_s28 + $0x1a8] sm:$0xff]  }
  0xe6   : > { %2799 = vmatprep.mubr.bf16.mxu0 %v3079_v26 }
  0xed   : > { %2800 = vmatmul.mubr.bf16.gmra.mxu0 %v3080_v27 }
  0xee   : > { %2803 = vmatprep.mubr.bf16.mxu0 %v3081_v28  ;;  %v3115_v28 = vld [vmem:[%s3636_s28 + $0x1b0] sm:$0xff]  }
  0xf5   : > { %2804 = vmatmul.mubr.bf16.gmra.mxu0 %v3082_v29 }
  0xf6   : > { %2807 = vmatprep.mubr.bf16.mxu0 %v3083_v30 }
  0xfd   : > { %2808 = vmatmul.mubr.bf16.gmra.mxu0 %v3084_v31 }
  0xfe   : > { %2811 = vmatprep.mubr.bf16.mxu0 %v3085_v32 }
 0x105   : > { %2812 = vmatmul.mubr.bf16.gmra.mxu0 %v3086_v33 }
 0x106   : > { %2815 = vmatprep.mubr.bf16.mxu0 %v3087_v34 }
 0x10d   : > { %2816 = vmatmul.mubr.bf16.gmra.mxu0 %v3088_v35 }
 0x10e   : > { %2819 = vmatprep.mubr.bf16.mxu0 %v3089_v36 }
 0x115   : > { %2820 = vmatmul.mubr.bf16.gmra.mxu0 %v3090_v37 }
 0x116   : > { %2823 = vmatprep.mubr.bf16.mxu0 %v3091_v38 }
 0x11d   : > { %2824 = vmatmul.mubr.bf16.gmra.mxu0 %v3092_v39 }
 0x11e   : > { %2827 = vmatprep.mubr.bf16.mxu0 %v3093_v40  ;;  %v3116_v40 = vld [vmem:[%s3636_s28 + $0x1b8] sm:$0xff]  }
 0x125   : > { %2828 = vmatmul.mubr.bf16.gmra.mxu0 %v3094_v41  ;;  %v3117_v41 = vld [vmem:[%s3636_s28 + $0x1c0] sm:$0xff]  }
 0x126   : > { %2831 = vmatprep.mubr.bf16.mxu0 %v3095_v42 }
 0x12d   : > { %2832 = vmatmul.mubr.bf16.gmra.mxu0 %v3096_v43 }
 0x12e   : > { %2835 = vmatprep.mubr.bf16.mxu0 %v3097_v44 }
 0x135   : > { %2836 = vmatmul.mubr.bf16.gmra.mxu0 %v3098_v45 }
 0x136   : > { %2839 = vmatprep.mubr.bf16.mxu0 %v3099_v46  ;;  %v3118_v46 = vld [vmem:[%s3636_s28 + $0x1c8] sm:$0xff]  }
 0x13d   : > { %2840 = vmatmul.mubr.bf16.gmra.mxu0 %v3100_v47  ;;  %v3119_v47 = vld [vmem:[%s3636_s28 + $0x1d0] sm:$0xff]  }
 0x13e   : > { %2843 = vmatprep.mubr.bf16.mxu0 %v3101_v48 }
 0x145   : > { %2844 = vmatmul.mubr.bf16.gmra.mxu0 %v3102_v49 }
 0x146   : > { %2847 = vmatprep.mubr.bf16.mxu0 %v3103_v50 }
 0x14d   : > { %2848 = vmatmul.mubr.bf16.gmra.mxu0 %v3104_v51 }
 0x14e   : > { %2851 = vmatprep.mubr.bf16.mxu0 %v3105_v52  ;;  %v3120_v52 = vld [vmem:[%s3636_s28 + $0x1d8] sm:$0xff]  }
 0x155   : > { %2852 = vmatmul.mubr.bf16.gmra.mxu0 %v3106_v53  ;;  %v3121_v53 = vld [vmem:[%s3636_s28 + $0x1e0] sm:$0xff]  }
 0x156   : > { %2855 = vmatprep.mubr.bf16.mxu0 %v3107_v54 }
 0x15d   : > { %2856 = vmatmul.mubr.bf16.gmra.mxu0 %v3108_v55 }
 0x15e   : > { %2859 = vmatprep.mubr.bf16.mxu0 %v3109_v56 }
 0x165   : > { %v2765_v3 = vpop.f32.mrf.mxu0  ;;  %2860 = vmatmul.mubr.bf16.gmra.mxu0 %v3110_v62 }
 0x166   : > { %2863 = vmatprep.mubr.bf16.mxu0 %v3111_v63  ;;  %v1075_v7 = vadd.f32 %v2765_v3, %v3716_v4  ;;  %v3124_v3 = vld [vmem:[%s3636_s28 + $0x1f8] sm:$0xff]  }
 0x167   : > { %v1066_v6 = vpop.f32.mrf.mxu0 }
 0x168   : > { %v1067_v10 = vadd.f32 %v3716_v4, %v1066_v6  ;;  %v1579_v14 = vmax.f32 %v1075_v7, 0.0 }
 0x169   : > { %v2766_v8 = vpop.f32.mrf.mxu0 }
 0x16a   : > { %v1078_v11 = vadd.f32 %v2766_v8, %v3716_v4  ;;  %v1577_v18 = vmax.f32 %v1067_v10, 0.0 }
 0x16b   : > { %v1069_v13 = vpop.f32.mrf.mxu0 }
 0x16c   : > { %v1580_v15 = vmax.f32 %v1078_v11, 0.0  ;;  %v1070_v16 = vadd.f32 %v3716_v4, %v1069_v13 }
 0x16d   : > { %v2769_v17 = vpop.f32.mrf.mxu0  ;;  %2864 = vmatmul.mubr.bf16.gmra.mxu0 %v3112_v9 }
 0x16e   : > { %v3726_v19 = vpack.c.bf16 %v1580_v15, %v1579_v14  ;;  %v1578_v20 = vmax.f32 %v1070_v16, 0.0  ;;  %2867 = vmatprep.mubr.bf16.mxu0 %v3113_v12  ;;  %v1091_v22 = vadd.f32 %v2769_v17, %v3716_v4 }
 0x16f   : > { %v1082_v21 = vpop.f32.mrf.mxu0 }
 0x170   : > { %v3729_v23 = vpack.c.bf16 %v1578_v20, %v1577_v18  ;;  %v1083_v26 = vadd.f32 %v3716_v4, %v1082_v21  ;;  %v1583_v30 = vmax.f32 %v1091_v22, 0.0 }
 0x171   : > { %v2770_v24 = vpop.f32.mrf.mxu0 }
 0x172   : > { %v1094_v27 = vadd.f32 %v2770_v24, %v3716_v4  ;;  %v1581_v34 = vmax.f32 %v1083_v26, 0.0 }
 0x173   : > { %v1085_v29 = vpop.f32.mrf.mxu0 }
 0x174   : > { %v1584_v31 = vmax.f32 %v1094_v27, 0.0  ;;  %v1086_v32 = vadd.f32 %v3716_v4, %v1085_v29 }
 0x175   : > { %v3736_v33 = vpop.f32.mrf.mxu0  ;;  %2868 = vmatmul.mubr.bf16.gmra.mxu0 %v3114_v25 }
 0x176   : > { %v3738_v35 = vpack.c.bf16 %v1584_v31, %v1583_v30  ;;  %v1582_v36 = vmax.f32 %v1086_v32, 0.0  ;;  %2871 = vmatprep.mubr.bf16.mxu0 %v3115_v28 }
 0x177   : > { %v3740_v37 = vpop.f32.mrf.mxu0 }
 0x178   : > { %v3742_v38 = vpack.c.bf16 %v1582_v36, %v1581_v34 }
 0x179   : > { %v2774_v39 = vpop.f32.mrf.mxu0 }
 0x17a   : > { %v1110_v27 = vadd.f32 %v2774_v39, %v3716_v4 }
 0x17b   : > { %v3746_v42 = vpop.f32.mrf.mxu0 }
 0x17c   : > { %v1588_v39 = vmax.f32 %v1110_v27, 0.0 }
 0x17d   : > { %v2777_v43 = vpop.f32.mrf.mxu0  ;;  %2872 = vmatmul.mubr.bf16.gmra.mxu0 %v3116_v40 }
 0x17e   : > { %2875 = vmatprep.mubr.bf16.mxu0 %v3117_v41  ;;  %v1123_v10 = vadd.f32 %v2777_v43, %v3716_v4 }
 0x17f   : > { %v1114_v44 = vpop.f32.mrf.mxu0 }
 0x180   : > { %v1591_v22 = vmax.f32 %v1123_v10, 0.0  ;;  %v1115_v24 = vadd.f32 %v3716_v4, %v1114_v44  ;;  %v1107_v44 = vadd.f32 %v3736_v33, %v3716_v4 }
 0x181   : > { %v2778_v45 = vpop.f32.mrf.mxu0 }
 0x182   : > { %v1126_v7 = vadd.f32 %v2778_v45, %v3716_v4  ;;  %v1589_v45 = vmax.f32 %v1115_v24, 0.0 }
 0x183   : > { %v1117_v48 = vpop.f32.mrf.mxu0 }
 0x184   : > { %v1592_v14 = vmax.f32 %v1126_v7, 0.0  ;;  %v1118_v15 = vadd.f32 %v3716_v4, %v1117_v48 }
 0x185   : > { %v3750_v49 = vpop.f32.mrf.mxu0  ;;  %2876 = vmatmul.mubr.bf16.gmra.mxu0 %v3118_v46 }
 0x186   : > { %2879 = vmatprep.mubr.bf16.mxu0 %v3119_v47  ;;  %v1590_v31 = vmax.f32 %v1118_v15, 0.0  ;;  %v1714_v36 = vpack.c.bf16 %v1592_v14, %v1591_v22 }
 0x187   : > { %v3752_v50 = vpop.f32.mrf.mxu0 }
 0x188   : > { %v1713_v33 = vpack.c.bf16 %v1590_v31, %v1589_v45 }
 0x189   : > { %v3754_v51 = vpop.f32.mrf.mxu0 }
 0x18b   : > { %v3758_v54 = vpop.f32.mrf.mxu0 }
 0x18d   : > { %v3760_v55 = vpop.f32.mrf.mxu0  ;;  %2880 = vmatmul.mubr.bf16.gmra.mxu0 %v3120_v52 }
 0x18e   : > { %2883 = vmatprep.mubr.bf16.mxu0 %v3121_v53 }
 0x18f   : > { %v3762_v56 = vpop.f32.mrf.mxu0 }
 0x190   : > { %v1147_v24 = vadd.f32 %v3716_v4, %v3762_v56 }
 0x191   : > { %v2786_v57 = vpop.f32.mrf.mxu0 }
 0x193   : > { %v3766_v60 = vpop.f32.mrf.mxu0 }
 0x195   : > { %v2789_v61 = vpop.f32.mrf.mxu0  ;;  %2884 = vmatmul.mubr.bf16.gmra.mxu0 %v3122_v58  ;;  %v1102_v58 = vadd.f32 %v3716_v4, %v3746_v42 }
 0x196   : > { %2887 = vmatprep.mubr.bf16.mxu0 %v3123_v59  ;;  %v1171_v25 = vadd.f32 %v2789_v61, %v3716_v4  ;;  %v1158_v59 = vadd.f32 %v2786_v57, %v3716_v4 }
 0x197   : > { %v1162_v62 = vpop.f32.mrf.mxu0  ;;  %v1586_v14 = vmax.f32 %v1102_v58, 0.0 }
 0x198   : > { %v1603_v46 = vmax.f32 %v1171_v25, 0.0  ;;  %v1163_v48 = vadd.f32 %v3716_v4, %v1162_v62  ;;  %v1099_v62 = vadd.f32 %v3716_v4, %v3740_v37  ;;  %v1600_v15 = vmax.f32 %v1158_v59, 0.0 }
 0x199   : > { %v2790_v63 = vpop.f32.mrf.mxu0 }
 0x19a   : > { %v1174_v16 = vadd.f32 %v2790_v63, %v3716_v4  ;;  %v1601_v42 = vmax.f32 %v1163_v48, 0.0 }
 0x19b   : > { %v1165_v5 = vpop.f32.mrf.mxu0 }
 0x19c   : > { %v1604_v32 = vmax.f32 %v1174_v16, 0.0  ;;  %v1166_v40 = vadd.f32 %v3716_v4, %v1165_v5 }
 0x19d   : > { %v2793_v6 = vpop.f32.mrf.mxu0  ;;  %2888 = vmatmul.mubr.bf16.gmra.mxu0 %v3124_v3 }
 0x19e   : > { %v1187_v9 = vadd.f32 %v2793_v6, %v3716_v4  ;;  %v1720_v61 = vpack.c.bf16 %v1604_v32, %v1603_v46  ;;  %v1602_v3 = vmax.f32 %v1166_v40, 0.0  ;;  %v1597_v40 = vmax.f32 %v1147_v24, 0.0 }
 0x19f   : > { %v1178_v8 = vpop.f32.mrf.mxu0  ;;  %v1134_v46 = vadd.f32 %v3716_v4, %v3758_v54  ;;  %v1773_v54 = vcombine.high %v3707_v1, %v3707_v1 }
 0x1a0   : > { %v1179_v12 = vadd.f32 %v3716_v4, %v1178_v8  ;;  %v1607_v18 = vmax.f32 %v1187_v9, 0.0  ;;  %v1587_v8 = vmax.f32 %v1107_v44, 0.0  ;;  %v1155_v9 = vadd.f32 %v3760_v55, %v3716_v4 }
 0x1a1   : > { %v2794_v11 = vpop.f32.mrf.mxu0  ;;  %v1594_v59 = vmax.f32 %v1134_v46, 0.0 }
 0x1a2   : > { %v1190_v13 = vadd.f32 %v2794_v11, %v3716_v4  ;;  %v1605_v28 = vmax.f32 %v1179_v12, 0.0 }
 0x1a3   : > { %v1181_v17 = vpop.f32.mrf.mxu0 }
 0x1a4   : > { %v1608_v20 = vmax.f32 %v1190_v13, 0.0  ;;  %v1182_v21 = vadd.f32 %v3716_v4, %v1181_v17  ;;  %v1712_v13 = vpack.c.bf16 %v1588_v39, %v1587_v8  ;;  %v1150_v17 = vadd.f32 %v3716_v4, %v3766_v60 }
 0x1a5   : > { %v2797_v26 = vpop.f32.mrf.mxu0  ;;  %v1142_v60 = vadd.f32 %v3754_v51, %v3716_v4 }
 0x1a6   : > { %v1606_v29 = vmax.f32 %v1182_v21, 0.0  ;;  %v1722_v30 = vpack.c.bf16 %v1608_v20, %v1607_v18  ;;  %v1203_v43 = vadd.f32 %v2797_v26, %v3716_v4  ;;  %v1719_v18 = vpack.c.bf16 %v1602_v3, %v1601_v42 }
 0x1a7   : > { %v1194_v34 = vpop.f32.mrf.mxu0  ;;  %v1585_v20 = vmax.f32 %v1099_v62, 0.0  ;;  %v1599_v21 = vmax.f32 %v1155_v9, 0.0  ;;  %v1596_v45 = vmax.f32 %v1142_v60, 0.0 }
 0x1a8   : > { %v1721_v41 = vpack.c.bf16 %v1606_v29, %v1605_v28  ;;  %2632 = vmatprep.subr.bf16.mxu1 %v1722_v30  ;;  %v1195_v52 = vadd.f32 %v3716_v4, %v1194_v34  ;;  %v1611_v5 = vmax.f32 %v1203_v43, 0.0  ;;  %v1598_v30 = vmax.f32 %v1150_v17, 0.0 }
 0x1a9   : > { %v2798_v47 = vpop.f32.mrf.mxu0  ;;  %2633 = vmatpush3.bf16.msra.mxu1 %v1714_v36  ;;  %v1718_v27 = vpack.c.bf16 %v1600_v15, %v1599_v21  ;;  %v1711_v29 = vpack.c.bf16 %v1586_v14, %v1585_v20  ;;  %v1139_v36 = vadd.f32 %v3750_v49, %v3716_v4 }
 0x1aa   : > { %v1206_v53 = vadd.f32 %v2798_v47, %v3716_v4  ;;  %2634 = vmatprep.subr.bf16.mxu1 %v1721_v41  ;;  %v1609_v11 = vmax.f32 %v1195_v52, 0.0  ;;  %v1717_v47 = vpack.c.bf16 %v1598_v30, %v1597_v40  ;;  %v1131_v52 = vadd.f32 %v3716_v4, %v3752_v50 }
 0x1ab   : > { %v1197_v63 = vpop.f32.mrf.mxu0  ;;  %v1595_v49 = vmax.f32 %v1139_v36, 0.0  ;;  %v3831_v50 = vrot.slane %v1773_v54, %v3705_v0 }
 0x1ac   : > { %v1612_v6 = vmax.f32 %v1206_v53, 0.0  ;;  %v1198_v7 = vadd.f32 %v3716_v4, %v1197_v63  ;;  %v1593_v63 = vmax.f32 %v1131_v52, 0.0 }
 0x1ad   : > { %v2801_v10 = vpop.f32.mrf.mxu0  ;;  %2635 = vmatpush3.bf16.msra.mxu1 %v1713_v33  ;;  %v1716_v58 = vpack.c.bf16 %v1596_v45, %v1595_v49 }
 0x1ae   : > { %v3795_v57 = vpack.c.bf16 %v1612_v6, %v1611_v5  ;;  %v1610_v12 = vmax.f32 %v1198_v7, 0.0  ;;  %2636 = vmatprep.subr.bf16.mxu1 %v1720_v61  ;;  %v1219_v55 = vadd.f32 %v2801_v10, %v3716_v4  ;;  %v1715_v3 = vpack.c.bf16 %v1594_v59, %v1593_v63 }
 0x1af   : > { %v1210_v16 = vpop.f32.mrf.mxu0 }
 0x1b0   : > { %v3799_v37 = vpack.c.bf16 %v1610_v12, %v1609_v11  ;;  %v1211_v25 = vadd.f32 %v3716_v4, %v1210_v16  ;;  %v1615_v31 = vmax.f32 %v1219_v55, 0.0 }
 0x1b1   : > { %v2802_v22 = vpop.f32.mrf.mxu0  ;;  %2637 = vmatpush3.bf16.msra.mxu1 %v1712_v13 }
 0x1b2   : > { %v1222_v26 = vadd.f32 %v2802_v22, %v3716_v4  ;;  %2638 = vmatprep.subr.bf16.mxu1 %v1719_v18  ;;  %v1613_v41 = vmax.f32 %v1211_v25, 0.0 }
 0x1b3   : > { %v1213_v28 = vpop.f32.mrf.mxu0 }
 0x1b4   : > { %v1616_v32 = vmax.f32 %v1222_v26, 0.0  ;;  %v1214_v34 = vadd.f32 %v3716_v4, %v1213_v28 }
 0x1b5   : > { %v3811_v56 = vpop.f32.mrf.mxu0  ;;  %2639 = vmatpush3.bf16.msra.mxu1 %v1711_v29 }
 0x1b6   : > { %v3813_v43 = vpack.c.bf16 %v1616_v32, %v1615_v31  ;;  %v1614_v44 = vmax.f32 %v1214_v34, 0.0  ;;  %2640 = vmatprep.subr.bf16.mxu1 %v1718_v27  ;;  %v1235_v52 = vadd.f32 %v3811_v56, %v3716_v4 }
 0x1b7   : > { %v3815_v51 = vpop.f32.mrf.mxu0 }
 0x1b8   : > { %v3819_v39 = vpack.c.bf16 %v1614_v44, %v1613_v41 }
 0x1b9   : > { %v2806_v48 = vpop.f32.mrf.mxu0  ;;  %2641 = vmatpush3.bf16.msra.mxu1 %v3738_v35 }
 0x1ba   : > { %2642 = vmatprep.subr.bf16.mxu1 %v1717_v47  ;;  %v1238_v31 = vadd.f32 %v2806_v48, %v3716_v4 }
 0x1bb   : > { %v3824_v53 = vpop.f32.mrf.mxu0 }
 0x1bc   : > { %v1620_v48 = vmax.f32 %v1238_v31, 0.0 }
 0x1bd   : > { %v2809_v61 = vpop.f32.mrf.mxu0  ;;  %2643 = vmatpush3.bf16.msra.mxu1 %v3742_v38  ;;  %v1789_v38 = vcombine.high %v3831_v50, %v3831_v50 }
 0x1be   : > { %2644 = vmatprep.subr.bf16.mxu1 %v1716_v58  ;;  %v1251_v16 = vadd.f32 %v2809_v61, %v3716_v4 }
 0x1bf   : > { %v1242_v33 = vpop.f32.mrf.mxu0 }
 0x1c0   : > { %v1623_v27 = vmax.f32 %v1251_v16, 0.0  ;;  %v1243_v28 = vadd.f32 %v3716_v4, %v1242_v33 }
 0x1c1   : > { %v2810_v35 = vpop.f32.mrf.mxu0  ;;  %2645 = vmatpush3.bf16.msra.mxu1 %v3726_v19 }
 0x1c2   : > { %2646 = vmatprep.subr.bf16.mxu1 %v1715_v3  ;;  %v1254_v14 = vadd.f32 %v2810_v35, %v3716_v4  ;;  %v1621_v58 = vmax.f32 %v1243_v28, 0.0  ;;  %v1230_v3 = vadd.f32 %v3716_v4, %v3824_v53 }
 0x1c3   : > { %v1245_v5 = vpop.f32.mrf.mxu0 }
 0x1c4   : > { %v1624_v20 = vmax.f32 %v1254_v14, 0.0  ;;  %v1246_v21 = vadd.f32 %v3716_v4, %v1245_v5  ;;  %v1619_v14 = vmax.f32 %v1235_v52, 0.0 }
 0x1c5   : > { %v3833_v6 = vpop.f32.mrf.mxu0  ;;  %2647 = vmatpush3.bf16.msra.mxu1 %v3729_v23 }
 0x1c6   : > { %v1730_v40 = vpack.c.bf16 %v1624_v20, %v1623_v27  ;;  %v1622_v41 = vmax.f32 %v1246_v21, 0.0 }
 0x1c7   : > { %v3838_v1 = vpop.f32.mrf.mxu0 }
 0x1c8   : > { %1848 = vmatmul.mubr.bf16.vlgmr.msra.gmra.mxu1 %v3711_v2  ;;  %v1729_v35 = vpack.c.bf16 %v1622_v41, %v1621_v58 }
 0x1c9   : > { %v3841_v7 = vpop.f32.mrf.mxu0  ;;  %1887 = vmatprep.mubr.bf16.mxu1 %v1789_v38 }
 0x1cb   : > { %v3843_v19 = vpop.f32.mrf.mxu0 }
 0x1cc   : > { %v1262_v58 = vadd.f32 %v3716_v4, %v3843_v19  ;;  %v3906_v19 = vld [vmem:[#allocation7 + $0x8] sm:$0xff] }
 0x1cd   : > { %v2817_v8 = vpop.f32.mrf.mxu0 }
 0x1cf   : > { %v3845_v62 = vpop.f32.mrf.mxu0 }
 0x1d0   : > { %v1275_v27 = vadd.f32 %v3716_v4, %v3845_v62 }
 0x1d1   : > { %v2818_v9 = vpop.f32.mrf.mxu0 }
 0x1d2   : > { %v1286_v5 = vadd.f32 %v2818_v9, %v3716_v4 }
 0x1d3   : > { %v3847_v10 = vpop.f32.mrf.mxu0 }
 0x1d4   : > { %v1632_v20 = vmax.f32 %v1286_v5, 0.0 }
 0x1d5   : > { %v2821_v42 = vpop.f32.mrf.mxu0 }
 0x1d6   : > { %v1299_v29 = vadd.f32 %v2821_v42, %v3716_v4 }
 0x1d7   : > { %v1290_v23 = vpop.f32.mrf.mxu0 }
 0x1d8   : > { %v1635_v59 = vmax.f32 %v1299_v29, 0.0  ;;  %v1291_v54 = vadd.f32 %v3716_v4, %v1290_v23  ;;  %v1227_v23 = vadd.f32 %v3716_v4, %v3815_v51 }
 0x1d9   : > { %v2822_v11 = vpop.f32.mrf.mxu0 }
 0x1da   : > { %v1302_v22 = vadd.f32 %v2822_v11, %v3716_v4  ;;  %v1633_v16 = vmax.f32 %v1291_v54, 0.0  ;;  %v1259_v54 = vadd.f32 %v3716_v4, %v3838_v1 }
 0x1db   : > { %v1293_v12 = vpop.f32.mrf.mxu0 }
 0x1dc   : > { %v1636_v44 = vmax.f32 %v1302_v22, 0.0  ;;  %v1294_v46 = vadd.f32 %v3716_v4, %v1293_v12  ;;  %v1278_v22 = vadd.f32 %v3716_v4, %v3847_v10  ;;  %v1270_v10 = vadd.f32 %v3841_v7, %v3716_v4 }
 0x1dd   : > { %v2825_v13 = vpop.f32.mrf.mxu0  ;;  %v1625_v5 = vmax.f32 %v1259_v54, 0.0 }
 0x1de   : > { %v1315_v2 = vadd.f32 %v2825_v13, %v3716_v4  ;;  %v1736_v38 = vpack.c.bf16 %v1636_v44, %v1635_v59  ;;  %v1634_v42 = vmax.f32 %v1294_v46, 0.0  ;;  %v1267_v44 = vadd.f32 %v3833_v6, %v3716_v4 }
 0x1df   : > { %v1306_v15 = vpop.f32.mrf.mxu0  ;;  %v1628_v52 = vmax.f32 %v1270_v10, 0.0 }
 0x1e0   : > { %v1307_v18 = vadd.f32 %v3716_v4, %v1306_v15  ;;  %v1639_v25 = vmax.f32 %v1315_v2, 0.0  ;;  %v1283_v15 = vadd.f32 %v2817_v8, %v3716_v4  ;;  %v1617_v8 = vmax.f32 %v1227_v23, 0.0 }
 0x1e1   : > { %v2826_v17 = vpop.f32.mrf.mxu0  ;;  %v1627_v6 = vmax.f32 %v1267_v44, 0.0 }
 0x1e2   : > { %v1318_v55 = vadd.f32 %v2826_v17, %v3716_v4  ;;  %v1637_v32 = vmax.f32 %v1307_v18, 0.0  ;;  %v1728_v18 = vpack.c.bf16 %v1620_v48, %v1619_v14 }
 0x1e3   : > { %v1309_v24 = vpop.f32.mrf.mxu0 }
 0x1e4   : > { %v1640_v26 = vmax.f32 %v1318_v55, 0.0  ;;  %v1310_v60 = vadd.f32 %v3716_v4, %v1309_v24  ;;  %v1618_v55 = vmax.f32 %v1230_v3, 0.0  ;;  %v1735_v24 = vpack.c.bf16 %v1634_v42, %v1633_v16 }
 0x1e5   : > { %v2829_v30 = vpop.f32.mrf.mxu0  ;;  %v1626_v3 = vmax.f32 %v1262_v58, 0.0 }
 0x1e6   : > { %v1738_v34 = vpack.c.bf16 %v1640_v26, %v1639_v25  ;;  %v1638_v36 = vmax.f32 %v1310_v60, 0.0  ;;  %v1331_v49 = vadd.f32 %v2829_v30, %v3716_v4  ;;  %v1631_v26 = vmax.f32 %v1283_v15, 0.0 }
 0x1e7   : > { %v1322_v45 = vpop.f32.mrf.mxu0  ;;  %v1727_v30 = vpack.c.bf16 %v1618_v55, %v1617_v8 }
 0x1e8   : > { %v1737_v47 = vpack.c.bf16 %v1638_v36, %v1637_v32  ;;  %2654 = vmatprep.subr.bf16.mxu1 %v1738_v34  ;;  %v1323_v63 = vadd.f32 %v3716_v4, %v1322_v45  ;;  %v1643_v11 = vmax.f32 %v1331_v49, 0.0  ;;  %v1734_v31 = vpack.c.bf16 %v1632_v20, %v1631_v26 }
 0x1e9   : > { %v2830_v61 = vpop.f32.mrf.mxu0  ;;  %2655 = vmatpush3.bf16.msra.mxu1 %v1730_v40  ;;  %v1630_v34 = vmax.f32 %v1278_v22, 0.0  ;;  %v1629_v45 = vmax.f32 %v1275_v27, 0.0 }
 0x1ea   : > { %v1334_v33 = vadd.f32 %v2830_v61, %v3716_v4  ;;  %2656 = vmatprep.subr.bf16.mxu1 %v1737_v47  ;;  %v1641_v53 = vmax.f32 %v1323_v63, 0.0 }
 0x1eb   : > { %v1325_v56 = vpop.f32.mrf.mxu0  ;;  %v1733_v59 = vpack.c.bf16 %v1630_v34, %v1629_v45 }
 0x1ec   : > { %v1644_v12 = vmax.f32 %v1334_v33, 0.0  ;;  %v1326_v13 = vadd.f32 %v3716_v4, %v1325_v56  ;;  %v1732_v33 = vpack.c.bf16 %v1628_v52, %v1627_v6  ;;  %v1731_v56 = vpack.c.bf16 %v1626_v3, %v1625_v5 }
 0x1ed   : > { %v2833_v2 = vpop.f32.mrf.mxu0  ;;  %2657 = vmatpush3.bf16.msra.mxu1 %v1729_v35 }
 0x1ee   : > { %v3874_v17 = vpack.c.bf16 %v1644_v12, %v1643_v11  ;;  %v1642_v9 = vmax.f32 %v1326_v13, 0.0  ;;  %2658 = vmatprep.subr.bf16.mxu1 %v1736_v38  ;;  %v1347_v51 = vadd.f32 %v2833_v2, %v3716_v4 }
 0x1ef   : > { %v1338_v21 = vpop.f32.mrf.mxu0 }
 0x1f0   : > { %v3878_v25 = vpack.c.bf16 %v1642_v9, %v1641_v53  ;;  %v1339_v28 = vadd.f32 %v3716_v4, %v1338_v21  ;;  %v1647_v36 = vmax.f32 %v1347_v51, 0.0 }
 0x1f1   : > { %v2834_v60 = vpop.f32.mrf.mxu0  ;;  %2659 = vmatpush3.bf16.msra.mxu1 %v1728_v18 }
 0x1f2   : > { %v1350_v29 = vadd.f32 %v2834_v60, %v3716_v4  ;;  %2660 = vmatprep.subr.bf16.mxu1 %v1735_v24  ;;  %v1645_v46 = vmax.f32 %v1339_v28, 0.0 }
 0x1f3   : > { %v1341_v32 = vpop.f32.mrf.mxu0 }
 0x1f4   : > { %v1648_v40 = vmax.f32 %v1350_v29, 0.0  ;;  %v1342_v41 = vadd.f32 %v3716_v4, %v1341_v32 }
 0x1f5   : > { %v3890_v62 = vpop.f32.mrf.mxu0  ;;  %2661 = vmatpush3.bf16.msra.mxu1 %v1727_v30 }
 0x1f6   : > { %v3892_v47 = vpack.c.bf16 %v1648_v40, %v1647_v36  ;;  %v1646_v49 = vmax.f32 %v1342_v41, 0.0  ;;  %2662 = vmatprep.subr.bf16.mxu1 %v1734_v31  ;;  %v1363_v54 = vadd.f32 %v3890_v62, %v3716_v4 }
 0x1f7   : > { %v3894_v7 = vpop.f32.mrf.mxu0 }
 0x1f8   : > { %v3898_v61 = vpack.c.bf16 %v1646_v49, %v1645_v46 }
 0x1f9   : > { %v2838_v48 = vpop.f32.mrf.mxu0  ;;  %2663 = vmatpush3.bf16.msra.mxu1 %v3813_v43  ;;  %v3911_v43 = vrot.slane %v3906_v19, %v3705_v0 }
 0x1fa   : > { %2664 = vmatprep.subr.bf16.mxu1 %v1733_v59  ;;  %v1366_v36 = vadd.f32 %v2838_v48, %v3716_v4 }
 0x1fb   : > { %v3903_v63 = vpop.f32.mrf.mxu0 }
 0x1fc   : > { %v1652_v48 = vmax.f32 %v1366_v36, 0.0 }
 0x1fd   : > { %v2841_v35 = vpop.f32.mrf.mxu0  ;;  %2665 = vmatpush3.bf16.msra.mxu1 %v3819_v39  ;;  %v1805_v39 = vcombine.high %v3911_v43, %v3911_v43 }
 0x1fe   : > { %2666 = vmatprep.subr.bf16.mxu1 %v1732_v33  ;;  %v1379_v21 = vadd.f32 %v2841_v35, %v3716_v4 }
 0x1ff   : > { %v1370_v38 = vpop.f32.mrf.mxu0 }
 0x200   : > { %v1655_v10 = vmax.f32 %v1379_v21, 0.0  ;;  %v1371_v31 = vadd.f32 %v3716_v4, %v1370_v38 }
 0x201   : > { %v2842_v42 = vpop.f32.mrf.mxu0  ;;  %2667 = vmatpush3.bf16.msra.mxu1 %v3795_v57 }
 0x202   : > { %2668 = vmatprep.subr.bf16.mxu1 %v1731_v56  ;;  %v1382_v55 = vadd.f32 %v2842_v42, %v3716_v4  ;;  %v1653_v33 = vmax.f32 %v1371_v31, 0.0  ;;  %v1358_v42 = vadd.f32 %v3716_v4, %v3903_v63 }
 0x203   : > { %v1373_v1 = vpop.f32.mrf.mxu0 }
 0x204   : > { %v1656_v8 = vmax.f32 %v1382_v55, 0.0  ;;  %v1374_v26 = vadd.f32 %v3716_v4, %v1373_v1 }
 0x205   : > { %v3913_v11 = vpop.f32.mrf.mxu0  ;;  %2669 = vmatpush3.bf16.msra.mxu1 %v3799_v37 }
 0x206   : > { %v1746_v45 = vpack.c.bf16 %v1656_v8, %v1655_v10  ;;  %v1654_v46 = vmax.f32 %v1374_v26, 0.0  ;;  %v1650_v8 = vmax.f32 %v1358_v42, 0.0 }
 0x207   : > { %v3918_v12 = vpop.f32.mrf.mxu0 }
 0x208   : > { %1888 = vmatmul.mubr.bf16.vlgmr.msra.gmra.mxu1 %v3831_v50  ;;  %v1745_v1 = vpack.c.bf16 %v1654_v46, %v1653_v33 }
 0x209   : > { %v3921_v13 = vpop.f32.mrf.mxu0  ;;  %1927 = vmatprep.mubr.bf16.mxu1 %v1805_v39 }
 0x20b   : > { %v3923_v57 = vpop.f32.mrf.mxu0 }
 0x20d   : > { %v2849_v14 = vpop.f32.mrf.mxu0 }
 0x20f   : > { %v3925_v23 = vpop.f32.mrf.mxu0 }
 0x210   : > { %v1403_v31 = vadd.f32 %v3716_v4, %v3925_v23 }
 0x211   : > { %v2850_v15 = vpop.f32.mrf.mxu0 }
 0x212   : > { %v1414_v39 = vadd.f32 %v2850_v15, %v3716_v4 }
 0x213   : > { %v3927_v2 = vpop.f32.mrf.mxu0 }
 0x214   : > { %v1664_v26 = vmax.f32 %v1414_v39, 0.0 }
 0x215   : > { %v2853_v16 = vpop.f32.mrf.mxu0 }
 0x216   : > { %v1427_v32 = vadd.f32 %v2853_v16, %v3716_v4 }
 0x217   : > { %v1418_v37 = vpop.f32.mrf.mxu0 }
 0x218   : > { %v1667_v3 = vmax.f32 %v1427_v32, 0.0  ;;  %v1419_v5 = vadd.f32 %v3716_v4, %v1418_v37  ;;  %v1355_v37 = vadd.f32 %v3716_v4, %v3894_v7 }
 0x219   : > { %v2854_v53 = vpop.f32.mrf.mxu0 }
 0x21a   : > { %v1430_v60 = vadd.f32 %v2854_v53, %v3716_v4 }
 0x21b   : > { %v1421_v9 = vpop.f32.mrf.mxu0 }
 0x21c   : > { %v1668_v49 = vmax.f32 %v1430_v60, 0.0  ;;  %v1422_v58 = vadd.f32 %v3716_v4, %v1421_v9 }
 0x21d   : > { %v2857_v18 = vpop.f32.mrf.mxu0 }
 0x21e   : > { %v1443_v50 = vadd.f32 %v2857_v18, %v3716_v4  ;;  %v1752_v16 = vpack.c.bf16 %v1668_v49, %v1667_v3  ;;  %v1666_v53 = vmax.f32 %v1422_v58, 0.0  ;;  %v1661_v58 = vmax.f32 %v1403_v31, 0.0 }
 0x21f   : > { %v1434_v20 = vpop.f32.mrf.mxu0  ;;  %v1390_v3 = vadd.f32 %v3716_v4, %v3923_v57  ;;  %v1790_v57 = vcombine.high %v3906_v19, %v3906_v19 }
 0x220   : > { %v1435_v24 = vadd.f32 %v3716_v4, %v1434_v20  ;;  %v1671_v28 = vmax.f32 %v1443_v50, 0.0  ;;  %v1651_v20 = vmax.f32 %v1363_v54, 0.0  ;;  %v1411_v50 = vadd.f32 %v2849_v14, %v3716_v4 }
 0x221   : > { %v2858_v22 = vpop.f32.mrf.mxu0  ;;  %v1649_v14 = vmax.f32 %v1355_v37, 0.0 }
 0x222   : > { %v1446_v51 = vadd.f32 %v2858_v22, %v3716_v4  ;;  %v1669_v40 = vmax.f32 %v1435_v24, 0.0  ;;  %v1665_v22 = vmax.f32 %v1419_v5, 0.0 }
 0x223   : > { %v1437_v27 = vpop.f32.mrf.mxu0  ;;  %v1743_v36 = vpack.c.bf16 %v1650_v8, %v1649_v14 }
 0x224   : > { %v1672_v29 = vmax.f32 %v1446_v51, 0.0  ;;  %v1438_v30 = vadd.f32 %v3716_v4, %v1437_v27  ;;  %v1744_v51 = vpack.c.bf16 %v1652_v48, %v1651_v20  ;;  %v1406_v27 = vadd.f32 %v3716_v4, %v3927_v2 }
 0x225   : > { %v2861_v34 = vpop.f32.mrf.mxu0  ;;  %v1398_v2 = vadd.f32 %v3921_v13, %v3716_v4 }
 0x226   : > { %v1754_v41 = vpack.c.bf16 %v1672_v29, %v1671_v28  ;;  %v1670_v44 = vmax.f32 %v1438_v30, 0.0  ;;  %v1459_v6 = vadd.f32 %v2861_v34, %v3716_v4  ;;  %v1751_v28 = vpack.c.bf16 %v1666_v53, %v1665_v22 }
 0x227   : > { %v1450_v52 = vpop.f32.mrf.mxu0  ;;  %v1663_v30 = vmax.f32 %v1411_v50, 0.0  ;;  %v1660_v33 = vmax.f32 %v1398_v2, 0.0 }
 0x228   : > { %v1753_v59 = vpack.c.bf16 %v1670_v44, %v1669_v40  ;;  %2676 = vmatprep.subr.bf16.mxu1 %v1754_v41  ;;  %v1451_v38 = vadd.f32 %v3716_v4, %v1450_v52  ;;  %v1675_v9 = vmax.f32 %v1459_v6, 0.0  ;;  %v1662_v44 = vmax.f32 %v1406_v27, 0.0 }
 0x229   : > { %v2862_v35 = vpop.f32.mrf.mxu0  ;;  %2677 = vmatpush3.bf16.msra.mxu1 %v1746_v45  ;;  %v1750_v40 = vpack.c.bf16 %v1664_v26, %v1663_v30  ;;  %v1395_v52 = vadd.f32 %v3913_v11, %v3716_v4 }
 0x22a   : > { %v1462_v56 = vadd.f32 %v2862_v35, %v3716_v4  ;;  %2678 = vmatprep.subr.bf16.mxu1 %v1753_v59  ;;  %v1673_v63 = vmax.f32 %v1451_v38, 0.0  ;;  %v1749_v35 = vpack.c.bf16 %v1662_v44, %v1661_v58  ;;  %v1387_v38 = vadd.f32 %v3716_v4, %v3918_v12 }
 0x22b   : > { %v1453_v62 = vpop.f32.mrf.mxu0  ;;  %v1659_v11 = vmax.f32 %v1395_v52, 0.0  ;;  %v3990_v12 = vrot.slane %v1790_v57, %v3705_v0 }
 0x22c   : > { %v1676_v18 = vmax.f32 %v1462_v56, 0.0  ;;  %v1454_v55 = vadd.f32 %v3716_v4, %v1453_v62 }
 0x22d   : > { %v2865_v21 = vpop.f32.mrf.mxu0  ;;  %2679 = vmatpush3.bf16.msra.mxu1 %v1745_v1  ;;  %v1748_v42 = vpack.c.bf16 %v1660_v33, %v1659_v11  ;;  %v1658_v1 = vmax.f32 %v1390_v3, 0.0 }
 0x22e   : > { %v3954_v24 = vpack.c.bf16 %v1676_v18, %v1675_v9  ;;  %v1674_v15 = vmax.f32 %v1454_v55, 0.0  ;;  %2680 = vmatprep.subr.bf16.mxu1 %v1752_v16  ;;  %v1475_v7 = vadd.f32 %v2865_v21, %v3716_v4  ;;  %v1657_v16 = vmax.f32 %v1387_v38, 0.0 }
 0x22f   : > { %v1466_v60 = vpop.f32.mrf.mxu0 }
 0x230   : > { %v3958_v29 = vpack.c.bf16 %v1674_v15, %v1673_v63  ;;  %v1467_v32 = vadd.f32 %v3716_v4, %v1466_v60  ;;  %v1679_v45 = vmax.f32 %v1475_v7, 0.0  ;;  %v1747_v53 = vpack.c.bf16 %v1658_v1, %v1657_v16 }
 0x231   : > { %v2866_v10 = vpop.f32.mrf.mxu0  ;;  %2681 = vmatpush3.bf16.msra.mxu1 %v1744_v51 }
 0x232   : > { %v1478_v34 = vadd.f32 %v2866_v10, %v3716_v4  ;;  %2682 = vmatprep.subr.bf16.mxu1 %v1751_v28  ;;  %v1677_v59 = vmax.f32 %v1467_v32, 0.0 }
 0x233   : > { %v1469_v41 = vpop.f32.mrf.mxu0 }
 0x234   : > { %v1680_v46 = vmax.f32 %v1478_v34, 0.0  ;;  %v1470_v49 = vadd.f32 %v3716_v4, %v1469_v41 }
 0x235   : > { %v3970_v23 = vpop.f32.mrf.mxu0  ;;  %2683 = vmatpush3.bf16.msra.mxu1 %v1743_v36 }
 0x236   : > { %v3972_v6 = vpack.c.bf16 %v1680_v46, %v1679_v45  ;;  %v1678_v54 = vmax.f32 %v1470_v49, 0.0  ;;  %2684 = vmatprep.subr.bf16.mxu1 %v1750_v40  ;;  %v1491_v33 = vadd.f32 %v3970_v23, %v3716_v4 }
 0x237   : > { %v3974_v13 = vpop.f32.mrf.mxu0 }
 0x238   : > { %v3978_v48 = vpack.c.bf16 %v1678_v54, %v1677_v59 }
 0x239   : > { %v2870_v5 = vpop.f32.mrf.mxu0  ;;  %2685 = vmatpush3.bf16.msra.mxu1 %v3892_v47 }
 0x23a   : > { %2686 = vmatprep.subr.bf16.mxu1 %v1749_v35  ;;  %v1494_v46 = vadd.f32 %v2870_v5, %v3716_v4  ;;  %v3151_v5 = vld [vmem:[%s4122_s2] ss:$0 sm:$0xff] }
 0x23b   : > { %v3983_v56 = vpop.f32.mrf.mxu0  ;;  %v1483_v23 = vadd.f32 %v3151_v5, %v3974_v13 }
 0x23c   : > { %v1684_v38 = vmax.f32 %v1494_v46, 0.0 }
 0x23d   : > { %v2873_v39 = vpop.f32.mrf.mxu0  ;;  %2687 = vmatpush3.bf16.msra.mxu1 %v3898_v61  ;;  %v1806_v61 = vcombine.high %v3990_v12, %v3990_v12 }
 0x23e   : > { %2688 = vmatprep.subr.bf16.mxu1 %v1748_v42  ;;  %v1486_v42 = vadd.f32 %v3151_v5, %v3983_v56 }
 0x23f   : > { %v1498_v62 = vpop.f32.mrf.mxu0 }
 0x240   : > { %v1499_v2 = vadd.f32 %v3716_v4, %v1498_v62  ;;  %v1683_v62 = vmax.f32 %v1491_v33, 0.0 }
 0x241   : > { %v2874_v47 = vpop.f32.mrf.mxu0  ;;  %2689 = vmatpush3.bf16.msra.mxu1 %v3874_v17 }
 0x242   : > { %2690 = vmatprep.subr.bf16.mxu1 %v1747_v53  ;;  %v1510_v51 = vadd.f32 %v2874_v47, %v3716_v4  ;;  %v1685_v3 = vmax.f32 %v1499_v2, 0.0 }
 0x243   : > { %v1501_v9 = vpop.f32.mrf.mxu0 }
 0x244   : > { %v1688_v7 = vmax.f32 %v1510_v51, 0.0  ;;  %v1502_v14 = vadd.f32 %v3716_v4, %v1501_v9  ;;  %v1682_v9 = vmax.f32 %v1486_v42, 0.0 }
 0x245   : > { %v3992_v18 = vpop.f32.mrf.mxu0  ;;  %2691 = vmatpush3.bf16.msra.mxu1 %v3878_v25 }
 0x246   : > { %v1686_v52 = vmax.f32 %v1502_v14, 0.0  ;;  %v1523_v13 = vadd.f32 %v3151_v5, %v3992_v18 }
 0x247   : > { %v3997_v19 = vpop.f32.mrf.mxu0 }
 0x248   : > { %1928 = vmatmul.mubr.bf16.vlgmr.msra.gmra.mxu1 %v3911_v43  ;;  %v1507_v43 = vadd.f32 %v2873_v39, %v3716_v4  ;;  %v1761_v1 = vpack.c.bf16 %v1686_v52, %v1685_v3 }
 0x249   : > { %v4000_v55 = vpop.f32.mrf.mxu0  ;;  %1967 = vmatprep.mubr.bf16.mxu1 %v1806_v61 }
 0x24a   : > { %v1687_v36 = vmax.f32 %v1507_v43, 0.0 }
 0x24b   : > { %v4002_v17 = vpop.f32.mrf.mxu0 }
 0x24c   : > { %v1762_v49 = vpack.c.bf16 %v1688_v7, %v1687_v36  ;;  %v1518_v43 = vadd.f32 %v3151_v5, %v4002_v17  ;;  %v3133_v36 = vld [vmem:[#allocation8 + $0x8] sm:$0xff]  }
 0x24d   : > { %v2881_v0 = vpop.f32.mrf.mxu0 }
 0x24e   : > { %v1539_v53 = vadd.f32 %v3151_v5, %v2881_v0 }
 0x24f   : > { %v1530_v20 = vpop.f32.mrf.mxu0 }
 0x250   : > { %v1531_v56 = vadd.f32 %v3151_v5, %v1530_v20  ;;  %v1515_v20 = vadd.f32 %v3151_v5, %v3997_v19 }
 0x251   : > { %v2882_v37 = vpop.f32.mrf.mxu0 }
 0x252   : > { %v1542_v39 = vadd.f32 %v3151_v5, %v2882_v37  ;;  %v1693_v0 = vmax.f32 %v1531_v56, 0.0 }
 0x253   : > { %v1533_v50 = vpop.f32.mrf.mxu0 }
 0x254   : > { %v1696_v61 = vmax.f32 %v1542_v39, 0.0 }
 0x255   : > { %v2885_v21 = vpop.f32.mrf.mxu0 }
 0x256   : > { %v1555_v40 = vadd.f32 %v2885_v21, %v3716_v4  ;;  %v1534_v21 = vadd.f32 %v3151_v5, %v1533_v50 }
 0x257   : > { %v1546_v22 = vpop.f32.mrf.mxu0 }
 0x258   : > { %v1699_v35 = vmax.f32 %v1555_v40, 0.0  ;;  %v1547_v11 = vadd.f32 %v3716_v4, %v1546_v22 }
 0x259   : > { %v2886_v63 = vpop.f32.mrf.mxu0 }
 0x25a   : > { %v1558_v10 = vadd.f32 %v2886_v63, %v3716_v4  ;;  %v1697_v47 = vmax.f32 %v1547_v11, 0.0  ;;  %v1681_v63 = vmax.f32 %v1483_v23, 0.0  ;;  %v3139_v23 = vld [vmem:[#allocation10 + $0x18] sm:$0xff]  }
 0x25b   : > { %v1549_v25 = vpop.f32.mrf.mxu0 }
 0x25c   : > { %v1700_v58 = vmax.f32 %v1558_v10, 0.0  ;;  %v1550_v59 = vadd.f32 %v3716_v4, %v1549_v25  ;;  %v1695_v25 = vmax.f32 %v1539_v53, 0.0  ;;  %v1759_v37 = vpack.c.bf16 %v1682_v9, %v1681_v63  ;;  %v3140_v53 = vld [vmem:[#allocation10 + $0x10] sm:$0xff]  }
 0x25d   : > { %v2889_v15 = vpop.f32.mrf.mxu0  ;;  %v3397_v10 = vmov 0.0   ;;  %v2531_v9 = vld [vmem:[%s4125_s5] ss:$0 sm:$0xff] }
 0x25e   : > { %v1571_v26 = vadd.f32 %v2889_v15, %v3716_v4  ;;  %v1768_v57 = vpack.c.bf16 %v1700_v58, %v1699_v35  ;;  %v1698_v16 = vmax.f32 %v1550_v59, 0.0  ;;  %v1526_v15 = vadd.f32 %v3151_v5, %v4000_v55 }
 0x25f   : > { %v1562_v8 = vpop.f32.mrf.mxu0  ;;  %v1766_v51 = vpack.c.bf16 %v1696_v61, %v1695_v25  ;;  %v1689_v55 = vmax.f32 %v1515_v20, 0.0  ;;  %v3144_v20 = vld [vmem:[#allocation11 + $0x30] sm:$0xff]  }
 0x260   : > { %v1563_v27 = vadd.f32 %v3716_v4, %v1562_v8  ;;  %v1703_v31 = vmax.f32 %v1571_v26, 0.0  ;;  %v1767_v22 = vpack.c.bf16 %v1698_v16, %v1697_v47  ;;  %v1694_v8 = vmax.f32 %v1534_v21, 0.0  ;;  %v3137_v16 = vld [vmem:[#allocation10 + $0x28] sm:$0xff]  }
 0x261   : > { %v2890_v60 = vpop.f32.mrf.mxu0  ;;  %v1692_v26 = vmax.f32 %v1526_v15, 0.0  ;;  %v3141_v47 = vld [vmem:[#allocation10 + $0x8] sm:$0xff]  }
 0x262   : > { %v1574_v28 = vadd.f32 %v2890_v60, %v3716_v4  ;;  %v1701_v41 = vmax.f32 %v1563_v27, 0.0  ;;  %v1765_v50 = vpack.c.bf16 %v1694_v8, %v1693_v0  ;;  %v1691_v60 = vmax.f32 %v1523_v13, 0.0 }
 0x263   : > { %v1565_v30 = vpop.f32.mrf.mxu0 }
 0x264   : > { %v1704_v32 = vmax.f32 %v1574_v28, 0.0  ;;  %v1566_v34 = vadd.f32 %v3716_v4, %v1565_v30  ;;  %v1760_v4 = vpack.c.bf16 %v1684_v38, %v1683_v62  ;;  %v1764_v27 = vpack.c.bf16 %v1692_v26, %v1691_v60  ;;  %v3127_v30 = vld [vmem:[#allocation8 + $0x38] sm:$0xff]   ;;  %v3138_v62 = vld [vmem:[#allocation10 + $0x20] sm:$0xff]  }
 0x265   : > { %v1690_v28 = vmax.f32 %v1518_v43, 0.0 }
 0x266   : > { %v1770_v44 = vpack.c.bf16 %v1704_v32, %v1703_v31  ;;  %v1702_v45 = vmax.f32 %v1566_v34, 0.0  ;;  %v3132_v31 = vld [vmem:[#allocation8 + $0x10] sm:$0xff]  }
 0x267   : > { %v1763_v7 = vpack.c.bf16 %v1690_v28, %v1689_v55  ;;  %v3146_v28 = vld [vmem:[#allocation11 + $0x20] sm:$0xff]   ;;  %v3147_v55 = vld [vmem:[#allocation11 + $0x18] sm:$0xff]  }
 0x268   : > { %v1769_v54 = vpack.c.bf16 %v1702_v45, %v1701_v41  ;;  %2698 = vmatprep.subr.bf16.mxu1 %v1770_v44  ;;  %v3134_v45 = vld [vmem:[#allocation8] sm:$0xff]  }
 0x269   : > { %2699 = vmatpush3.bf16.msra.mxu1 %v1762_v49 }
 0x26a   : > { %2700 = vmatprep.subr.bf16.mxu1 %v1769_v54 }
 0x26d   : > { %2701 = vmatpush3.bf16.msra.mxu1 %v1761_v1  ;;  %v3135_v1 = vld [vmem:[#allocation10 + $0x38] sm:$0xff]  }
 0x26e   : > { %2702 = vmatprep.subr.bf16.mxu1 %v1768_v57  ;;  %v3136_v57 = vld [vmem:[#allocation10 + $0x30] sm:$0xff]  }
 0x271   : > { %2703 = vmatpush3.bf16.msra.mxu1 %v1760_v4  ;;  %v3142_v4 = vld [vmem:[#allocation10] sm:$0xff]  }
 0x272   : > { %2704 = vmatprep.subr.bf16.mxu1 %v1767_v22 }
 0x275   : > { %2705 = vmatpush3.bf16.msra.mxu1 %v1759_v37 }
 0x276   : > { %2706 = vmatprep.subr.bf16.mxu1 %v1766_v51 }
 0x279   : > { %2707 = vmatpush3.bf16.msra.mxu1 %v3972_v6 }
 0x27a   : > { %2708 = vmatprep.subr.bf16.mxu1 %v1765_v50  ;;  %v3143_v50 = vld [vmem:[#allocation11 + $0x38] sm:$0xff]  }
 0x27d   : > { %2709 = vmatpush3.bf16.msra.mxu1 %v3978_v48  ;;  %v3128_v48 = vld [vmem:[#allocation8 + $0x30] sm:$0xff]  }
 0x27e   : > { %2710 = vmatprep.subr.bf16.mxu1 %v1764_v27  ;;  %v3145_v27 = vld [vmem:[#allocation11 + $0x28] sm:$0xff]  }
 0x281   : > { %2711 = vmatpush3.bf16.msra.mxu1 %v3954_v24  ;;  %v3129_v24 = vld [vmem:[#allocation8 + $0x28] sm:$0xff]  }
 0x282   : > { %2712 = vmatprep.subr.bf16.mxu1 %v1763_v7  ;;  %v3148_v7 = vld [vmem:[#allocation11 + $0x10] sm:$0xff]  }
 0x285   : > { %2713 = vmatpush3.bf16.msra.mxu1 %v3958_v29  ;;  %v3130_v29 = vld [vmem:[#allocation8 + $0x20] sm:$0xff]  }
 0x286   : > { %2891 = vmatprep.subr.bf16.mxu1 %v3397_v10 }
 0x288   : > { %1968 = vmatmul.mubr.bf16.vlgmr.msra.gmra.mxu1 %v3990_v12  ;;  %v2648_v18 = vpop.f32.mrf.mxu1  ;;  %v3131_v12 = vld [vmem:[#allocation8 + $0x18] sm:$0xff]  }
 0x289   : > { %2892 = vmatpush3.bf16.msra.mxu1 %v3127_v30  ;;  %2907 = vmatprep.mubr.msk.bf16.mxu1 %vm3398_vm0, %v3397_v10 }
 0x28a   : > { %v2649_v6 = vpop.f32.mrf.mxu1  ;;  %2893 = vmatprep.subr.bf16.mxu1 %v3397_v10 }
 0x28b   : > { %v2650_v17 = vadd.f32 %v2649_v6, %v2648_v18  ;;  %v3149_v18 = vld [vmem:[#allocation11 + $0x8] sm:$0xff]   ;;  %v3150_v6 = vld [vmem:[#allocation11] sm:$0xff]  }
 0x28c   : > { %v2651_v14 = vpop.f32.mrf.mxu1 }
 0x28d   : > { %2894 = vmatpush3.bf16.msra.mxu1 %v3128_v48 }
 0x28e   : > { %v2652_v19 = vpop.f32.mrf.mxu1  ;;  %2895 = vmatprep.subr.bf16.mxu1 %v3397_v10 }
 0x291   : > { %2896 = vmatpush3.bf16.msra.mxu1 %v3129_v24 }
 0x292   : > { %2897 = vmatprep.subr.bf16.mxu1 %v3397_v10 }
 0x295   : > { %2898 = vmatpush3.bf16.msra.mxu1 %v3130_v29 }
 0x296   : > { %2899 = vmatprep.subr.bf16.mxu1 %v3397_v10 }
 0x299   : > { %2900 = vmatpush3.bf16.msra.mxu1 %v3131_v12 }
 0x29a   : > { %2901 = vmatprep.subr.bf16.mxu1 %v3397_v10 }
 0x29d   : > { %2902 = vmatpush3.bf16.msra.mxu1 %v3132_v31 }
 0x29e   : > { %2903 = vmatprep.subr.bf16.mxu1 %v3397_v10 }
 0x2a1   : > { %2904 = vmatpush3.bf16.msra.mxu1 %v3133_v36 }
 0x2a2   : > { %2905 = vmatprep.subr.bf16.mxu1 %v3397_v10 }
 0x2a5   : > { %2906 = vmatpush3.bf16.msra.mxu1 %v3134_v45 }
 0x2a6   : > { %2911 = vmatprep.subr.bf16.mxu1 %v3397_v10 }
 0x2c8   : > { %v2670_v32 = vpop.f32.mrf.mxu1 }
 0x2ca   : > { %v2671_v34 = vpop.f32.mrf.mxu1 }
 0x2cb   : > { %v2672_v2 = vadd.f32 %v2671_v34, %v2670_v32 }
 0x2cc   : > { %v2673_v40 = vpop.f32.mrf.mxu1 }
 0x2cd   : > { %v1890_v41 = vadd.f32 %v2672_v2, %v2650_v17  ;;  %v2116_v17 = vld [vmem:[%s4127_s7] sm:$0x1] }
 0x2ce   : > { %v2674_v44 = vpop.f32.mrf.mxu1 }
 0x308   : > { %v2692_v46 = vpop.f32.mrf.mxu1 }
 0x30a   : > { %v2693_v49 = vpop.f32.mrf.mxu1 }
 0x30b   : > { %v2694_v52 = vadd.f32 %v2693_v49, %v2692_v46 }
 0x30c   : > { %v2695_v58 = vpop.f32.mrf.mxu1 }
 0x30d   : > { %v1930_v59 = vadd.f32 %v2694_v52, %v1890_v41 }
 0x30e   : > { %v2696_v54 = vpop.f32.mrf.mxu1 }
 0x348   : > { %v2714_v33 = vpop.f32.mrf.mxu1 }
 0x34a   : > { %v2715_v3 = vpop.f32.mrf.mxu1 }
 0x34b   : > { %v2716_v35 = vadd.f32 %v2715_v3, %v2714_v33 }
 0x34c   : > { %v2717_v11 = vpop.f32.mrf.mxu1 }
 0x34d   : > { %v1970_v38 = vadd.f32 %v2716_v35, %v1930_v59 }
 0x34e   : > { %v2718_v5 = vpop.f32.mrf.mxu1 }
 0x34f   : > { %v1975_v42 = vmul.f32 0.00390625, %v1970_v38 }
 0x351   : > { %v1976_v39 = vpack.c.bf16 %v1975_v42, %v1975_v42 }
 0x353   : > { %2908 = vmatmul.mubr.bf16.vlgmr.msra.gmra.mxu1 %v1976_v39 }
 0x354   : > { %2912 = vmatpush3.bf16.msra.mxu1 %v3135_v1  ;;  %2927 = vmatprep.mubr.msk.bf16.mxu1 %vm3398_vm0, %v3397_v10 }
 0x355   : > { %2913 = vmatprep.subr.bf16.mxu1 %v3397_v10 }
 0x358   : > { %2914 = vmatpush3.bf16.msra.mxu1 %v3136_v57 }
 0x359   : > { %2915 = vmatprep.subr.bf16.mxu1 %v3397_v10 }
 0x35c   : > { %2916 = vmatpush3.bf16.msra.mxu1 %v3137_v16 }
 0x35d   : > { %2917 = vmatprep.subr.bf16.mxu1 %v3397_v10 }
 0x360   : > { %2918 = vmatpush3.bf16.msra.mxu1 %v3138_v62 }
 0x361   : > { %2919 = vmatprep.subr.bf16.mxu1 %v3397_v10 }
 0x364   : > { %2920 = vmatpush3.bf16.msra.mxu1 %v3139_v23 }
 0x365   : > { %2921 = vmatprep.subr.bf16.mxu1 %v3397_v10 }
 0x368   : > { %2922 = vmatpush3.bf16.msra.mxu1 %v3140_v53 }
 0x369   : > { %2923 = vmatprep.subr.bf16.mxu1 %v3397_v10 }
 0x36c   : > { %2924 = vmatpush3.bf16.msra.mxu1 %v3141_v47 }
 0x36d   : > { %2925 = vmatprep.subr.bf16.mxu1 %v3397_v10 }
 0x370   : > { %2926 = vmatpush3.bf16.msra.mxu1 %v3142_v4 }
 0x371   : > { %2931 = vmatprep.subr.bf16.mxu1 %v3397_v10 }
 0x413   : > { %v2082_v61 = vpop.f32.mrf.mxu1 }
 0x414   : > { %v2083_v21 = vadd.f32 %v2531_v9, %v2082_v61 }
 0x415   : > { %v2909_v22 = vpop.f32.mrf.mxu1 }
 0x416   : > { %v2088_v63 = vmax.f32 %v2083_v21, 0.0 }
 0x417   : > { %v2085_v25 = vpop.f32.mrf.mxu1 }
 0x418   : > { %v2090_v56 = vsel %vm2089_vm1, %v2088_v63, 0.0 }
 0x419   : > { %v2091_v37 = vrot.slane %v2090_v56, 4  ;;  %v2910_v15 = vpop.f32.mrf.mxu1 }
 0x41b   : > { %v2092_v51 = vadd.f32 %v2091_v37, %v2090_v56 }
 0x41d   : > { %v2093_v8 = vrot.slane %v2092_v51, 2 }
 0x41f   : > { %v2094_v13 = vadd.f32 %v2093_v8, %v2092_v51 }
 0x421   : > { %v2095_v0 = vrot.slane %v2094_v13, 1 }
 0x423   : > { %v2096_v26 = vadd.f32 %v2095_v0, %v2094_v13 }
 0x425   : > { %v2098_v43 = vmul.f32 0.25, %v2096_v26 }
 0x427   : > { %v2099_v60 = vpack.c.bf16 %v2098_v43, %v2098_v43 }
 0x429   : > { %2928 = vmatmul.mubr.bf16.vlgmr.msra.gmra.mxu1 %v2099_v60 }
 0x42a   : > { %2932 = vmatpush3.bf16.msra.mxu1 %v3143_v50  ;;  %2947 = vmatprep.mubr.msk.bf16.mxu1 %vm3398_vm0, %v3397_v10 }
 0x42b   : > { %2933 = vmatprep.subr.bf16.mxu1 %v3397_v10 }
 0x42e   : > { %2934 = vmatpush3.bf16.msra.mxu1 %v3144_v20 }
 0x42f   : > { %2935 = vmatprep.subr.bf16.mxu1 %v3397_v10 }
 0x432   : > { %2936 = vmatpush3.bf16.msra.mxu1 %v3145_v27 }
 0x433   : > { %2937 = vmatprep.subr.bf16.mxu1 %v3397_v10 }
 0x436   : > { %2938 = vmatpush3.bf16.msra.mxu1 %v3146_v28 }
 0x437   : > { %2939 = vmatprep.subr.bf16.mxu1 %v3397_v10 }
 0x43a   : > { %2940 = vmatpush3.bf16.msra.mxu1 %v3147_v55 }
 0x43b   : > { %2941 = vmatprep.subr.bf16.mxu1 %v3397_v10 }
 0x43e   : > { %2942 = vmatpush3.bf16.msra.mxu1 %v3148_v7 }
 0x43f   : > { %2943 = vmatprep.subr.bf16.mxu1 %v3397_v10 }
 0x442   : > { %2944 = vmatpush3.bf16.msra.mxu1 %v3149_v18 }
 0x443   : > { %2945 = vmatprep.subr.bf16.mxu1 %v3397_v10  ;;  %v2223_v10 = vld [vmem:[%s4129_s9] sm:$0x1] }
 0x446   : > { %2946 = vmatpush3.bf16.msra.mxu1 %v3150_v6 }
 0x4e9   : > { %v2199_v14 = vpop.f32.mrf.mxu1 }
 0x4ea   : > { %v2200_v19 = vadd.f32 %v2199_v14, %v2116_v17 }
 0x4eb   : > { %v2929_v30 = vpop.f32.mrf.mxu1 }
 0x4ec   : > { %v2205_v48 = vmax.f32 %v2200_v19, 0.0 }
 0x4ed   : > { %v2202_v24 = vpop.f32.mrf.mxu1 }
 0x4ee   : > { %v2206_v29 = vpack.c.bf16 %v2205_v48, %v2205_v48 }
 0x4ef   : > { %v2930_v12 = vpop.f32.mrf.mxu1 }
 0x4f0   : > { %2948 = vmatmul.mubr.bf16.vlgmr.msra.gmra.mxu1 %v2206_v29 }
 0x5b0   : > { %v2306_v31 = vpop.f32.mrf.mxu1 }
 0x5b1   : > { %v2307_v32 = vadd.f32 %v2306_v31, %v2223_v10 }
 0x5b2   : > { %v2949_v34 = vpop.f32.mrf.mxu1 }
 0x5b3   : > { %2312 = vst [vmem:[%s447_s6] sm:$0x1] %v2307_v32 }
 0x5b4   : > { %v2309_v36 = vpop.f32.mrf.mxu1 }
 0x5b5   : > { %3323 = shalt.err (!%p3320_p3)
}
 0x5b6   : > { %s3324_s22 = scalar_lea.hbm %s4077_s20, 16  ;;  %s3328_s24 = scalar_lea.hbm %s4130_s10, 32 }
 0x5b7   : > { %p3325_p4 = scmp.ne.s32.totalorder %s4077_s20, %s3324_s22  ;;  %p3329_p2 = scmp.lt.s32.totalorder %s4077_s20, %s4130_s10 }
 0x5b8   : > { %p3330_p7 = scmp.lt.s32.totalorder %s3328_s24, %s3324_s22 }
 0x5b9   : > { %p3326_p12 = pnand %p3325_p4, %p4162_p11 }
 0x5ba   : > { %p3331_p8 = por %p3330_p7, %p3329_p2 }
 0x5bb   : > { %p3327_p6 = pneg %p3326_p12 }
 0x5bd   : > { %p3332_p10 = pnand %p3331_p8, %p3327_p6 }
 0x5bf   : > { %3335 = shalt.err (!%p3332_p10)
}
 0x5c0   : > { %2973 = dma.vmem_to_hbm [thread:$0]  (%p4162_p11), %s4079_s18, 16, %s4077_s20, %s2314_s29   ;;  %v2950_v2 = vpop.f32.mrf.mxu1 }
 0x5c1 PF: > { %s2338_s6 = sand.u32 1, %s3374_s13   ;;  %p4163_p0 = scmp.ne.s32.totalorder %s4150_s21, 0 }
 0x5c2   : > { %p4164_p13 = scmp.ge.s32.totalorder %s3386_s16, 2  ;;  %s2339_s28 = scalar_lea.sflag [#allocation4], %s2338_s6 }
 0x5c4   : > { %p2996_p5 = pnand %p4164_p13, %p4163_p0 }
 0x5c6   : > { %p2997_p9 = pneg %p2996_p5 }
 0x5c8   : > { %3369 = dma.done.wait (%p2997_p9), %s2339_s28, 16  }
 0x5c9   : > { %3371 = vsyncadd (%p2997_p9), %s2339_s28, 4294967280  ;;  %p26_p1 = scmp.ge.s32.totalorder %s3563_s26, 4   ;;  %s4165_s13 = smov %s3378_s14 }
 0x5ca   : > { %s4166_s14 = smov %s3382_s15  ;;  %s4167_s15 = smov %s3575_s11 }
 0x5cb   : > { %s4168_s16 = smov %s3563_s26  ;;  %28 = sbr.rel (!%p26_p1) target bundleno = 13 (0xd), region = 125 }
 0x5d0   :  { %2343 = vsyncpa [#allocation3], 1 }
 0x5d1   :  { %2345 = vsyncpa [#allocation3 + $0x1], 1 }
 0x5d2   :  { %2346 = vsyncpa [#allocation6], 1 }
 0x5d3   :  { %2347 = vsyncpa [#allocation9], 1 }
 0x5d4   :  { %2348 = vsyncpa [#allocation12], 1 }
 0x5d5   :  { %2349 = vsyncpa [#allocation4], 1 }
 0x5d6   :  { %2351 = vsyncpa [#allocation4 + $0x1], 1 }

</bundles_post_ra>
